<compile_context>
chip_gen: v7x
topology: tpu7x:2x2x1
jax: 0.10.0
libtpu: 0.0.40
codegen_flags: <defaults>
</compile_context>

<pallas_src>
import jax
import jax.numpy as jnp
from jax.experimental import pallas as pl
from jax.experimental.pallas import tpu as pltpu

IN_FEATURES = 4096
OUT_FEATURES = 2


def _round_up(x, m):
    return ((x + m - 1) // m) * m


def _classifier_kernel(x_ref, w_ref, b_ref, o_ref):
    # ReLU (VPU) -> matmul with f32 accumulation (MXU) -> bias add.
    x = jnp.maximum(x_ref[...], 0.0)
    acc = jnp.dot(x, w_ref[...], preferred_element_type=jnp.float32)
    o_ref[...] = (acc + b_ref[...]).astype(o_ref.dtype)


def dione_classifier(feat, weight_t, bias, *, tile_bytes=12 << 20):
    """feat: (B, 4096), weight_t: (4096, 2), bias: (2,) or (1, 2) -> (B, 2).

    feat/weight may be f32 or bf16; accumulation is always f32.
    """
    B, K = feat.shape
    assert K == IN_FEATURES
    assert weight_t.shape == (IN_FEATURES, OUT_FEATURES)
    bias2d = bias.reshape(1, OUT_FEATURES).astype(jnp.float32)

    itemsize = jnp.dtype(feat.dtype).itemsize
    # Sublane multiple: f32 -> 8, bf16 -> 16, int8/fp8 -> 32.
    sub = max(8, 32 // itemsize)
    row_bytes = IN_FEATURES * itemsize

    # Byte-based tile target (~12 MiB of feat per grid step).
    budget_rows = max(sub, (tile_bytes // row_bytes) // sub * sub)

    if B <= sub:
        # Single block; block dim == full array dim is always legal.
        tb = B
    elif B <= budget_rows:
        # Force 2 grid steps so both v7x TensorCores get work.
        tb = _round_up(pl.cdiv(B, 2), sub)
    else:
        tb = budget_rows
        steps = pl.cdiv(B, tb)
        if steps % 2 == 1:
            # Nudge to an even step count -> balanced across 2 TCs on v7x.
            tb = _round_up(pl.cdiv(B, steps + 1), sub)

    grid_steps = pl.cdiv(B, tb)

    cost = pl.CostEstimate(
        flops=2 * B * IN_FEATURES * OUT_FEATURES,
        transcendentals=0,
        bytes_accessed=(B * IN_FEATURES * itemsize
                        + IN_FEATURES * OUT_FEATURES
                        * jnp.dtype(weight_t.dtype).itemsize
                        + B * OUT_FEATURES * itemsize),
    )

    return pl.pallas_call(
        _classifier_kernel,
        out_shape=jax.ShapeDtypeStruct((B, OUT_FEATURES), feat.dtype),
        grid_spec=pltpu.PrefetchScalarGridSpec(
            num_scalar_prefetch=0,
            grid=(grid_steps,),
            in_specs=[
                # feat: tiled over batch, pipelined/double-buffered; edge block
                # may be partial (reads clipped, writes masked by Pallas).
                pl.BlockSpec((tb, IN_FEATURES), lambda i: (i, 0)),
                # weight / bias: constant index_map -> DMA'd once, VMEM-resident.
                pl.BlockSpec((IN_FEATURES, OUT_FEATURES), lambda i: (0, 0)),
                pl.BlockSpec((1, OUT_FEATURES), lambda i: (0, 0)),
            ],
            out_specs=pl.BlockSpec((tb, OUT_FEATURES), lambda i: (i, 0)),
        ),
        compiler_params=pltpu.CompilerParams(
            # Batch tiles are independent -> shard across TCs on v7x.
            dimension_semantics=("parallel",),
            vmem_limit_bytes=48 << 20,
        ),
        cost_estimate=cost,
    )(feat, weight_t, bias2d)


def _init_params(key):
    # Deterministic init mimicking nn.Linear default: U(-1/sqrt(fan_in), ...).
    kw, kb = jax.random.split(key)
    bound = 1.0 / jnp.sqrt(jnp.float32(IN_FEATURES))
    w = jax.random.uniform(kw, (OUT_FEATURES, IN_FEATURES), jnp.float32,
                           minval=-bound, maxval=bound)
    b = jax.random.uniform(kb, (OUT_FEATURES,), jnp.float32,
                           minval=-bound, maxval=bound)
    return w, b


def _reference(feat, w_t, b):
    return jnp.maximum(feat, 0.0) @ w_t + b.reshape(1, OUT_FEATURES)


if __name__ == "__main__":
    key = jax.random.PRNGKey(0)
    k1, k2, k3, kp = jax.random.split(key, 4)

    w, b = _init_params(kp)
    w_t = jnp.transpose(w)  # (4096, 2) — glue: PyTorch stores (out, in)

    # Small aligned batch: single full block (tb == B path).
    B = 8
    feat = jax.random.normal(k1, (B, IN_FEATURES), jnp.float32)
    out = jax.block_until_ready(dione_classifier(feat, w_t, b))
    assert out.shape == (B, OUT_FEATURES)
    assert jnp.allclose(out, _reference(feat, w_t, b), atol=1e-4, rtol=1e-4)

    # Ragged batch: 2 grid steps with a partial edge block, no jnp.pad copy.
    B2 = 11
    feat2 = jax.random.normal(k2, (B2, IN_FEATURES), jnp.float32)
    out2 = jax.block_until_ready(dione_classifier(feat2, w_t, b))
    assert out2.shape == (B2, OUT_FEATURES)
    assert jnp.allclose(out2, _reference(feat2, w_t, b), atol=1e-4, rtol=1e-4)

    # bf16 feat/weight (f32 accumulation in-kernel); byte-based tiling gives
    # bf16 2x the rows per tile of f32.
    B3 = 24
    feat3_f32 = jax.random.normal(k3, (B3, IN_FEATURES), jnp.float32)
    out3 = jax.block_until_ready(
        dione_classifier(feat3_f32.astype(jnp.bfloat16),
                         w_t.astype(jnp.bfloat16), b))
    assert out3.shape == (B3, OUT_FEATURES)
    assert jnp.allclose(out3.astype(jnp.float32),
                        _reference(feat3_f32, w_t, b), atol=5e-2, rtol=5e-2)

    print("KERNEL_OK")
</pallas_src>

<mosaic_0001>
module attributes {stable_mosaic.version = 11 : i64} {
  func.func @_classifier_kernel(%arg0: i32, %arg1: memref<8x4096xf32, #tpu.memory_space<vmem>>, %arg2: memref<4096x2xf32, #tpu.memory_space<vmem>>, %arg3: memref<1x2xf32, #tpu.memory_space<vmem>>, %arg4: memref<8x2xf32, #tpu.memory_space<vmem>>) attributes {dimension_semantics = [#tpu.dimension_semantics<parallel>], iteration_bounds = array<i64: 1>, scalar_prefetch = 0 : i64, scratch_operands = 0 : i64, tpu.core_type = #tpu.core_type<tc>, window_params = [{transform_indices = @transform_0, window_bounds = array<i64: 8, 4096>}, {pipeline_mode = #tpu.pipeline_mode<synchronous>, transform_indices = @transform_1, window_bounds = array<i64: 4096, 2>}, {pipeline_mode = #tpu.pipeline_mode<synchronous>, transform_indices = @transform_2, window_bounds = array<i64: 1, 2>}, {transform_indices = @transform_3, window_bounds = array<i64: 8, 2>}]} {
    %c0 = arith.constant 0 : index
    %c0_0 = arith.constant 0 : index
    %0 = vector.load %arg1[%c0, %c0_0] : memref<8x4096xf32, #tpu.memory_space<vmem>>, vector<8x4096xf32>
    %cst = arith.constant 0.000000e+00 : f32
    %1 = vector.broadcast %cst : f32 to vector<8x4096xf32>
    %2 = arith.maximumf %0, %1 : vector<8x4096xf32>
    %c0_1 = arith.constant 0 : index
    %c0_2 = arith.constant 0 : index
    %3 = vector.load %arg2[%c0_1, %c0_2] : memref<4096x2xf32, #tpu.memory_space<vmem>>, vector<4096x2xf32>
    %cst_3 = arith.constant dense<0.000000e+00> : vector<8x2xf32>
    %4 = tpu.matmul %2, %3, %cst_3 {dimension_numbers = #tpu.dot_dimension_numbers<[1], [0], [0], [1], [0, 0, 1, 1], [], []>} : vector<8x4096xf32>, vector<4096x2xf32>, vector<8x2xf32> -> vector<8x2xf32>
    %c0_4 = arith.constant 0 : index
    %c0_5 = arith.constant 0 : index
    %5 = vector.load %arg3[%c0_4, %c0_5] : memref<1x2xf32, #tpu.memory_space<vmem>>, vector<1x2xf32>
    %6 = vector.broadcast %5 : vector<1x2xf32> to vector<8x2xf32>
    %7 = arith.addf %4, %6 : vector<8x2xf32>
    %c0_6 = arith.constant 0 : index
    %c0_7 = arith.constant 0 : index
    %8 = vector.load %arg4[%c0_6, %c0_7] : memref<8x2xf32, #tpu.memory_space<vmem>>, vector<8x2xf32>
    tpu.vector_store %arg4[%c0_6, %c0_7], %7 {strides = array<i32>} : memref<8x2xf32, #tpu.memory_space<vmem>>, vector<8x2xf32>,
    return
  }
  func.func @transform_0(%arg0: i32) -> (i32, i32) {
    %c0_i32 = arith.constant 0 : i32
    %c0_i32_0 = arith.constant 0 : i32
    return %arg0, %c0_i32 : i32, i32
  }
  func.func @transform_1(%arg0: i32) -> (i32, i32) {
    %c0_i32 = arith.constant 0 : i32
    %c0_i32_0 = arith.constant 0 : i32
    %c0_i32_1 = arith.constant 0 : i32
    return %c0_i32, %c0_i32_0 : i32, i32
  }
  func.func @transform_2(%arg0: i32) -> (i32, i32) {
    %c0_i32 = arith.constant 0 : i32
    %c0_i32_0 = arith.constant 0 : i32
    %c0_i32_1 = arith.constant 0 : i32
    return %c0_i32, %c0_i32_0 : i32, i32
  }
  func.func @transform_3(%arg0: i32) -> (i32, i32) {
    %c0_i32 = arith.constant 0 : i32
    %c0_i32_0 = arith.constant 0 : i32
    return %arg0, %c0_i32 : i32, i32
  }
}

</mosaic_0001>

<bundles_post_ra>
// kernel: tpu_custom_call.1
= control target key start
LH: loop header
LB: loop body
LE: loop exit
PB: predicated region body
PF: predicated region fallthrough
CT: control target
= control target key end

     0   :  { %vm1717_vm0 = vcmask 15360   ;;  %s4454_s1 = inlined_call_operand.vmem [shape: f32[4096,2], index: 1, kind: input, shape index: {}]   ;;  %s4455_s0 = inlined_call_operand.vmem [shape: f32[8,4096], index: 0, kind: input, shape index: {}]   ;;  %s4456_s2 = inlined_call_operand.vmem [shape: f32[1,2], index: 2, kind: input, shape index: {}]   ;;  %s4457_s3 = inlined_call_operand.vmem [shape: f32[8,2], index: 3, kind: output, shape index: {}]  }
   0x1   :  { %v94_v0 = vld [vmem:[%s4454_s1 + $0x80] sm:$0xff]  ;;  %v95_v1 = vld [vmem:[%s4454_s1 + $0x88] sm:$0xff]  ;;  %v96_v11 = vld [vmem:[%s4454_s1 + $0x90] sm:$0xff] }
   0x2   :  { %v78_v2 = vld [vmem:[%s4454_s1] sm:$0xff]  ;;  %v2284_v3 = vpack.c.bf16 %v95_v1, %v94_v0  ;;  %v79_v4 = vld [vmem:[%s4454_s1 + $0x8] sm:$0xff]  ;;  %v97_v13 = vld [vmem:[%s4454_s1 + $0x98] sm:$0xff] }
   0x3   :  { %v126_v5 = vld [vmem:[%s4454_s1 + $0x180] sm:$0xff]  ;;  %v127_v6 = vld [vmem:[%s4454_s1 + $0x188] sm:$0xff]  ;;  %v2286_v7 = vpack.c.bf16 %v79_v4, %v78_v2  ;;  %v80_v14 = vld [vmem:[%s4454_s1 + $0x10] sm:$0xff]  ;;  %v2288_v16 = vpack.c.bf16 %v97_v13, %v96_v11 }
   0x4   :  { %v2316_v8 = vpack.c.bf16 %v127_v6, %v126_v5  ;;  %v110_v9 = vld [vmem:[%s4454_s1 + $0x100] sm:$0xff]  ;;  %v111_v10 = vld [vmem:[%s4454_s1 + $0x108] sm:$0xff]  ;;  %2285 = vmatprep.subr.bf16.mxu0 %v2284_v3  ;;  %v81_v15 = vld [vmem:[%s4454_s1 + $0x18] sm:$0xff] }
   0x5   :  { %v2318_v12 = vpack.c.bf16 %v111_v10, %v110_v9  ;;  %2287 = vmatpush3.bf16.msra.mxu0 %v2286_v7  ;;  %v2290_v17 = vpack.c.bf16 %v81_v15, %v80_v14  ;;  %v128_v18 = vld [vmem:[%s4454_s1 + $0x190] sm:$0xff]  ;;  %v129_v19 = vld [vmem:[%s4454_s1 + $0x198] sm:$0xff]  ;;  %v98_v23 = vld [vmem:[%s4454_s1 + $0xa0] sm:$0xff] }
   0x6   :  { %2317 = vmatprep.subr.bf16.mxu1 %v2316_v8  ;;  %v112_v20 = vld [vmem:[%s4454_s1 + $0x110] sm:$0xff]  ;;  %v2320_v21 = vpack.c.bf16 %v129_v19, %v128_v18  ;;  %v113_v22 = vld [vmem:[%s4454_s1 + $0x118] sm:$0xff]  ;;  %v99_v24 = vld [vmem:[%s4454_s1 + $0xa8] sm:$0xff]  ;;  %2289 = vmatprep.subr.bf16.mxu0 %v2288_v16 }
   0x7   :  { %2319 = vmatpush3.bf16.msra.mxu1 %v2318_v12  ;;  %v2322_v25 = vpack.c.bf16 %v113_v22, %v112_v20  ;;  %v2292_v26 = vpack.c.bf16 %v99_v24, %v98_v23  ;;  %v82_v27 = vld [vmem:[%s4454_s1 + $0x20] sm:$0xff]  ;;  %v83_v28 = vld [vmem:[%s4454_s1 + $0x28] sm:$0xff]  ;;  %v100_v35 = vld [vmem:[%s4454_s1 + $0xb0] sm:$0xff] }
   0x8   :  { %v130_v29 = vld [vmem:[%s4454_s1 + $0x1a0] sm:$0xff]  ;;  %2321 = vmatprep.subr.bf16.mxu1 %v2320_v21  ;;  %v131_v30 = vld [vmem:[%s4454_s1 + $0x1a8] sm:$0xff]  ;;  %v2294_v33 = vpack.c.bf16 %v83_v28, %v82_v27  ;;  %v101_v36 = vld [vmem:[%s4454_s1 + $0xb8] sm:$0xff] }
   0x9   :  { %v114_v31 = vld [vmem:[%s4454_s1 + $0x120] sm:$0xff]  ;;  %v115_v32 = vld [vmem:[%s4454_s1 + $0x128] sm:$0xff]  ;;  %2291 = vmatpush3.bf16.msra.mxu0 %v2290_v17  ;;  %v2324_v34 = vpack.c.bf16 %v131_v30, %v130_v29  ;;  %v84_v37 = vld [vmem:[%s4454_s1 + $0x30] sm:$0xff]  ;;  %v2296_v39 = vpack.c.bf16 %v101_v36, %v100_v35 }
   0xa   :  { %2293 = vmatprep.subr.bf16.mxu0 %v2292_v26  ;;  %v2326_v38 = vpack.c.bf16 %v115_v32, %v114_v31  ;;  %v85_v40 = vld [vmem:[%s4454_s1 + $0x38] sm:$0xff]  ;;  %v132_v41 = vld [vmem:[%s4454_s1 + $0x1b0] sm:$0xff]  ;;  %v102_v46 = vld [vmem:[%s4454_s1 + $0xc0] sm:$0xff] }
   0xb   :  { %2323 = vmatpush3.bf16.msra.mxu1 %v2322_v25  ;;  %v133_v42 = vld [vmem:[%s4454_s1 + $0x1b8] sm:$0xff]  ;;  %v116_v44 = vld [vmem:[%s4454_s1 + $0x130] sm:$0xff]  ;;  %v103_v47 = vld [vmem:[%s4454_s1 + $0xc8] sm:$0xff]  ;;  %v2298_v48 = vpack.c.bf16 %v85_v40, %v84_v37 }
   0xc   :  { %2325 = vmatprep.subr.bf16.mxu1 %v2324_v34  ;;  %v2328_v43 = vpack.c.bf16 %v133_v42, %v132_v41  ;;  %v117_v45 = vld [vmem:[%s4454_s1 + $0x138] sm:$0xff]  ;;  %v134_v49 = vld [vmem:[%s4454_s1 + $0x1c0] sm:$0xff]  ;;  %v135_v50 = vld [vmem:[%s4454_s1 + $0x1c8] sm:$0xff]  ;;  %v2300_v52 = vpack.c.bf16 %v103_v47, %v102_v46 }
   0xd   :  { %2295 = vmatpush3.bf16.msra.mxu0 %v2294_v33  ;;  %v2330_v51 = vpack.c.bf16 %v117_v45, %v116_v44  ;;  %v86_v53 = vld [vmem:[%s4454_s1 + $0x40] sm:$0xff]  ;;  %v87_v54 = vld [vmem:[%s4454_s1 + $0x48] sm:$0xff]  ;;  %v2332_v56 = vpack.c.bf16 %v135_v50, %v134_v49  ;;  %v104_v58 = vld [vmem:[%s4454_s1 + $0xd0] sm:$0xff] }
   0xe   :  { %2297 = vmatprep.subr.bf16.mxu0 %v2296_v39  ;;  %v118_v55 = vld [vmem:[%s4454_s1 + $0x140] sm:$0xff]  ;;  %v119_v57 = vld [vmem:[%s4454_s1 + $0x148] sm:$0xff]  ;;  %v105_v59 = vld [vmem:[%s4454_s1 + $0xd8] sm:$0xff]  ;;  %v2302_v62 = vpack.c.bf16 %v87_v54, %v86_v53 }
   0xf   :  { %2327 = vmatpush3.bf16.msra.mxu1 %v2326_v38  ;;  %v136_v60 = vld [vmem:[%s4454_s1 + $0x1d0] sm:$0xff]  ;;  %v137_v61 = vld [vmem:[%s4454_s1 + $0x1d8] sm:$0xff]  ;;  %v2334_v63 = vpack.c.bf16 %v119_v57, %v118_v55  ;;  %v2304_v0 = vpack.c.bf16 %v105_v59, %v104_v58  ;;  %v106_v6 = vld [vmem:[%s4454_s1 + $0xe0] sm:$0xff] }
  0x10   :  { %2329 = vmatprep.subr.bf16.mxu1 %v2328_v43  ;;  %v88_v1 = vld [vmem:[%s4454_s1 + $0x50] sm:$0xff]  ;;  %v89_v2 = vld [vmem:[%s4454_s1 + $0x58] sm:$0xff]  ;;  %v2336_v4 = vpack.c.bf16 %v137_v61, %v136_v60  ;;  %v107_v7 = vld [vmem:[%s4454_s1 + $0xe8] sm:$0xff] }
  0x11   :  { %2299 = vmatpush3.bf16.msra.mxu0 %v2298_v48  ;;  %v120_v3 = vld [vmem:[%s4454_s1 + $0x150] sm:$0xff]  ;;  %v121_v5 = vld [vmem:[%s4454_s1 + $0x158] sm:$0xff]  ;;  %v138_v8 = vld [vmem:[%s4454_s1 + $0x1e0] sm:$0xff]  ;;  %v2306_v10 = vpack.c.bf16 %v89_v2, %v88_v1  ;;  %v2308_v14 = vpack.c.bf16 %v107_v7, %v106_v6 }
  0x12   :  { %2301 = vmatprep.subr.bf16.mxu0 %v2300_v52  ;;  %v139_v9 = vld [vmem:[%s4454_s1 + $0x1e8] sm:$0xff]  ;;  %v90_v11 = vld [vmem:[%s4454_s1 + $0x60] sm:$0xff]  ;;  %v2338_v13 = vpack.c.bf16 %v121_v5, %v120_v3  ;;  %v108_v19 = vld [vmem:[%s4454_s1 + $0xf0] sm:$0xff] }
  0x13   :  { %2331 = vmatpush3.bf16.msra.mxu1 %v2330_v51  ;;  %v91_v12 = vld [vmem:[%s4454_s1 + $0x68] sm:$0xff]  ;;  %v122_v15 = vld [vmem:[%s4454_s1 + $0x160] sm:$0xff]  ;;  %v2340_v18 = vpack.c.bf16 %v139_v9, %v138_v8  ;;  %v109_v20 = vld [vmem:[%s4454_s1 + $0xf8] sm:$0xff] }
  0x14   :  { %2333 = vmatprep.subr.bf16.mxu1 %v2332_v56  ;;  %v123_v16 = vld [vmem:[%s4454_s1 + $0x168] sm:$0xff]  ;;  %v17_v22 = vld [vmem:[%s4455_s0 + $0x18] sm:$0xff]  ;;  %v140_v23 = vld [vmem:[%s4454_s1 + $0x1f0] sm:$0xff]  ;;  %v2310_v26 = vpack.c.bf16 %v91_v12, %v90_v11  ;;  %v2312_v28 = vpack.c.bf16 %v109_v20, %v108_v19 }
  0x15   :  { %2303 = vmatpush3.bf16.msra.mxu0 %v2302_v62  ;;  %v15_v17 = vld [vmem:[%s4455_s0 + $0x8] sm:$0xff]  ;;  %v141_v24 = vld [vmem:[%s4454_s1 + $0x1f8] sm:$0xff]  ;;  %v49_v25 = vmax.f32 %v17_v22, 0.0  ;;  %v2342_v27 = vpack.c.bf16 %v123_v16, %v122_v15  ;;  %v92_v29 = vld [vmem:[%s4454_s1 + $0x70] sm:$0xff] }
  0x16   :  { %2305 = vmatprep.subr.bf16.mxu0 %v2304_v0  ;;  %v47_v21 = vmax.f32 %v15_v17, 0.0  ;;  %v93_v30 = vld [vmem:[%s4454_s1 + $0x78] sm:$0xff]  ;;  %v124_v31 = vld [vmem:[%s4454_s1 + $0x170] sm:$0xff]  ;;  %v2344_v32 = vpack.c.bf16 %v141_v24, %v140_v23  ;;  %v158_v34 = vld [vmem:[%s4454_s1 + $0x280] sm:$0xff] }
  0x17   :  { %2335 = vmatpush3.bf16.msra.mxu1 %v2334_v63  ;;  %v125_v33 = vld [vmem:[%s4454_s1 + $0x178] sm:$0xff]  ;;  %v159_v35 = vld [vmem:[%s4454_s1 + $0x288] sm:$0xff]  ;;  %731 = vmatprep.mubr.f32.mxu1 %v49_v25  ;;  %v190_v36 = vld [vmem:[%s4454_s1 + $0x380] sm:$0xff]  ;;  %v2314_v38 = vpack.c.bf16 %v93_v30, %v92_v29 }
  0x18   :  { %2337 = vmatprep.subr.bf16.mxu1 %v2336_v4  ;;  %661 = vmatprep.mubr.f32.mxu0 %v47_v21  ;;  %v191_v37 = vld [vmem:[%s4454_s1 + $0x388] sm:$0xff]  ;;  %v14_v39 = vld [vmem:[%s4455_s0] sm:$0xff]  ;;  %v2346_v41 = vpack.c.bf16 %v125_v33, %v124_v31  ;;  %v2348_v42 = vpack.c.bf16 %v159_v35, %v158_v34  ;;  %v16_v44 = vld [vmem:[%s4455_s0 + $0x10] sm:$0xff] }
  0x19   :  { %2307 = vmatpush3.bf16.msra.mxu0 %v2306_v10  ;;  %v142_v40 = vld [vmem:[%s4454_s1 + $0x200] sm:$0xff]  ;;  %v143_v43 = vld [vmem:[%s4454_s1 + $0x208] sm:$0xff]  ;;  %v2380_v46 = vpack.c.bf16 %v191_v37, %v190_v36  ;;  %v160_v48 = vld [vmem:[%s4454_s1 + $0x290] sm:$0xff]  ;;  %v46_v50 = vmax.f32 %v14_v39, 0.0  ;;  %v48_v54 = vmax.f32 %v16_v44, 0.0 }
  0x1a   :  { %2309 = vmatprep.subr.bf16.mxu0 %v2308_v14  ;;  %v174_v45 = vld [vmem:[%s4454_s1 + $0x300] sm:$0xff]  ;;  %v175_v47 = vld [vmem:[%s4454_s1 + $0x308] sm:$0xff]  ;;  %v161_v49 = vld [vmem:[%s4454_s1 + $0x298] sm:$0xff]  ;;  %v2350_v53 = vpack.c.bf16 %v143_v43, %v142_v40 }
  0x1b   :  { %2339 = vmatpush3.bf16.msra.mxu1 %v2338_v13  ;;  %v192_v51 = vld [vmem:[%s4454_s1 + $0x390] sm:$0xff]  ;;  %v193_v52 = vld [vmem:[%s4454_s1 + $0x398] sm:$0xff]  ;;  %v2382_v55 = vpack.c.bf16 %v175_v47, %v174_v45  ;;  %v2352_v56 = vpack.c.bf16 %v161_v49, %v160_v48  ;;  %v162_v62 = vld [vmem:[%s4454_s1 + $0x2a0] sm:$0xff] }
  0x1c   :  { %2341 = vmatprep.subr.bf16.mxu1 %v2340_v18  ;;  %v144_v57 = vld [vmem:[%s4454_s1 + $0x210] sm:$0xff]  ;;  %v145_v58 = vld [vmem:[%s4454_s1 + $0x218] sm:$0xff]  ;;  %v2384_v60 = vpack.c.bf16 %v193_v52, %v192_v51  ;;  %v163_v63 = vld [vmem:[%s4454_s1 + $0x2a8] sm:$0xff] }
  0x1d   :  { %2311 = vmatpush3.bf16.msra.mxu0 %v2310_v26  ;;  %v176_v59 = vld [vmem:[%s4454_s1 + $0x310] sm:$0xff]  ;;  %v177_v61 = vld [vmem:[%s4454_s1 + $0x318] sm:$0xff]  ;;  %v194_v0 = vld [vmem:[%s4454_s1 + $0x3a0] sm:$0xff]  ;;  %v2354_v2 = vpack.c.bf16 %v145_v58, %v144_v57  ;;  %v2356_v4 = vpack.c.bf16 %v163_v63, %v162_v62 }
  0x1e   :  { %2313 = vmatprep.subr.bf16.mxu0 %v2312_v28  ;;  %v195_v1 = vld [vmem:[%s4454_s1 + $0x3a8] sm:$0xff]  ;;  %v2386_v3 = vpack.c.bf16 %v177_v61, %v176_v59  ;;  %v146_v5 = vld [vmem:[%s4454_s1 + $0x220] sm:$0xff]  ;;  %v164_v10 = vld [vmem:[%s4454_s1 + $0x2b0] sm:$0xff] }
  0x1f   :  { %2343 = vmatpush3.bf16.msra.mxu1 %v2342_v27  ;;  %v147_v6 = vld [vmem:[%s4454_s1 + $0x228] sm:$0xff]  ;;  %v178_v7 = vld [vmem:[%s4454_s1 + $0x320] sm:$0xff]  ;;  %v2388_v8 = vpack.c.bf16 %v195_v1, %v194_v0  ;;  %v165_v11 = vld [vmem:[%s4454_s1 + $0x2b8] sm:$0xff] }
  0x20   :  { %2345 = vmatprep.subr.bf16.mxu1 %v2344_v32  ;;  %v179_v9 = vld [vmem:[%s4454_s1 + $0x328] sm:$0xff]  ;;  %v196_v12 = vld [vmem:[%s4454_s1 + $0x3b0] sm:$0xff]  ;;  %v197_v13 = vld [vmem:[%s4454_s1 + $0x3b8] sm:$0xff]  ;;  %v2358_v14 = vpack.c.bf16 %v147_v6, %v146_v5  ;;  %v2360_v16 = vpack.c.bf16 %v165_v11, %v164_v10 }
  0x21   :  { %2315 = vmatpush3.bf16.msra.mxu0 %v2314_v38  ;;  %v2390_v15 = vpack.c.bf16 %v179_v9, %v178_v7  ;;  %v148_v17 = vld [vmem:[%s4454_s1 + $0x230] sm:$0xff]  ;;  %v149_v18 = vld [vmem:[%s4454_s1 + $0x238] sm:$0xff]  ;;  %v2392_v20 = vpack.c.bf16 %v197_v13, %v196_v12  ;;  %v166_v22 = vld [vmem:[%s4454_s1 + $0x2c0] sm:$0xff] }
  0x22   :  { %2349 = vmatprep.subr.bf16.mxu0 %v2348_v42  ;;  %v180_v19 = vld [vmem:[%s4454_s1 + $0x330] sm:$0xff]  ;;  %v181_v21 = vld [vmem:[%s4454_s1 + $0x338] sm:$0xff]  ;;  %v167_v23 = vld [vmem:[%s4454_s1 + $0x2c8] sm:$0xff]  ;;  %v2362_v26 = vpack.c.bf16 %v149_v18, %v148_v17 }
  0x23   :  { %2347 = vmatpush3.bf16.msra.mxu1 %v2346_v41  ;;  %v198_v24 = vld [vmem:[%s4454_s1 + $0x3c0] sm:$0xff]  ;;  %v199_v25 = vld [vmem:[%s4454_s1 + $0x3c8] sm:$0xff]  ;;  %v2394_v29 = vpack.c.bf16 %v181_v21, %v180_v19  ;;  %v2364_v30 = vpack.c.bf16 %v167_v23, %v166_v22  ;;  %v21_v34 = vld [vmem:[%s4455_s0 + $0x38] sm:$0xff] }
  0x24   :  { %2381 = vmatprep.subr.bf16.mxu1 %v2380_v46  ;;  %662 = vmatmul.mubr.f32.vlgmr.msra.gmra.mrb[0].mxu0 %v46_v50  ;;  %v150_v27 = vld [vmem:[%s4454_s1 + $0x240] sm:$0xff]  ;;  %v19_v28 = vld [vmem:[%s4455_s0 + $0x28] sm:$0xff]  ;;  %v2396_v35 = vpack.c.bf16 %v199_v25, %v198_v24  ;;  %v168_v37 = vld [vmem:[%s4454_s1 + $0x2d0] sm:$0xff]  ;;  %v53_v39 = vmax.f32 %v21_v34, 0.0 }
  0x25   :  { %2351 = vmatpush3.bf16.msra.mxu0 %v2350_v53  ;;  %v151_v31 = vld [vmem:[%s4454_s1 + $0x248] sm:$0xff]  ;;  %v182_v32 = vld [vmem:[%s4454_s1 + $0x340] sm:$0xff]  ;;  %v51_v33 = vmax.f32 %v19_v28, 0.0  ;;  %v169_v38 = vld [vmem:[%s4454_s1 + $0x2d8] sm:$0xff] }
  0x26   :  { %732 = vmatmul.mubr.f32.vlgmr.msra.gmra.mrb[0].mxu1 %v48_v54  ;;  %2353 = vmatprep.subr.bf16.mxu0 %v2352_v56  ;;  %v183_v36 = vld [vmem:[%s4454_s1 + $0x348] sm:$0xff]  ;;  %v200_v40 = vld [vmem:[%s4454_s1 + $0x3d0] sm:$0xff]  ;;  %v201_v41 = vld [vmem:[%s4454_s1 + $0x3d8] sm:$0xff]  ;;  %v2366_v42 = vpack.c.bf16 %v151_v31, %v150_v27  ;;  %v2368_v44 = vpack.c.bf16 %v169_v38, %v168_v37 }
  0x27   :  { %2383 = vmatpush3.bf16.msra.mxu1 %v2382_v55  ;;  %801 = vmatprep.mubr.f32.mxu0 %v51_v33  ;;  %v2398_v43 = vpack.c.bf16 %v183_v36, %v182_v32  ;;  %v152_v45 = vld [vmem:[%s4454_s1 + $0x250] sm:$0xff]  ;;  %v153_v46 = vld [vmem:[%s4454_s1 + $0x258] sm:$0xff]  ;;  %v2400_v48 = vpack.c.bf16 %v201_v41, %v200_v40  ;;  %v170_v50 = vld [vmem:[%s4454_s1 + $0x2e0] sm:$0xff] }
  0x28   :  { %2385 = vmatprep.subr.bf16.mxu1 %v2384_v60  ;;  %871 = vmatprep.mubr.f32.mxu1 %v53_v39  ;;  %v184_v47 = vld [vmem:[%s4454_s1 + $0x350] sm:$0xff]  ;;  %v185_v49 = vld [vmem:[%s4454_s1 + $0x358] sm:$0xff]  ;;  %v171_v51 = vld [vmem:[%s4454_s1 + $0x2e8] sm:$0xff]  ;;  %v2370_v54 = vpack.c.bf16 %v153_v46, %v152_v45 }
  0x29   :  { %2355 = vmatpush3.bf16.msra.mxu0 %v2354_v2  ;;  %v202_v52 = vld [vmem:[%s4454_s1 + $0x3e0] sm:$0xff]  ;;  %v203_v53 = vld [vmem:[%s4454_s1 + $0x3e8] sm:$0xff]  ;;  %v2402_v55 = vpack.c.bf16 %v185_v49, %v184_v47  ;;  %v2372_v56 = vpack.c.bf16 %v171_v51, %v170_v50  ;;  %v172_v62 = vld [vmem:[%s4454_s1 + $0x2f0] sm:$0xff] }
  0x2a   :  { %2357 = vmatprep.subr.bf16.mxu0 %v2356_v4  ;;  %v154_v57 = vld [vmem:[%s4454_s1 + $0x260] sm:$0xff]  ;;  %v155_v58 = vld [vmem:[%s4454_s1 + $0x268] sm:$0xff]  ;;  %v2404_v60 = vpack.c.bf16 %v203_v53, %v202_v52  ;;  %v173_v63 = vld [vmem:[%s4454_s1 + $0x2f8] sm:$0xff] }
  0x2b   :  { %2387 = vmatpush3.bf16.msra.mxu1 %v2386_v3  ;;  %v186_v59 = vld [vmem:[%s4454_s1 + $0x360] sm:$0xff]  ;;  %v187_v61 = vld [vmem:[%s4454_s1 + $0x368] sm:$0xff]  ;;  %v204_v0 = vld [vmem:[%s4454_s1 + $0x3f0] sm:$0xff]  ;;  %v2374_v2 = vpack.c.bf16 %v155_v58, %v154_v57  ;;  %v2376_v4 = vpack.c.bf16 %v173_v63, %v172_v62 }
  0x2c   :  { %2389 = vmatprep.subr.bf16.mxu1 %v2388_v8  ;;  %v205_v1 = vld [vmem:[%s4454_s1 + $0x3f8] sm:$0xff]  ;;  %v2406_v3 = vpack.c.bf16 %v187_v61, %v186_v59  ;;  %v156_v5 = vld [vmem:[%s4454_s1 + $0x270] sm:$0xff]  ;;  %v222_v10 = vld [vmem:[%s4454_s1 + $0x480] sm:$0xff] }
  0x2d   :  { %2359 = vmatpush3.bf16.msra.mxu0 %v2358_v14  ;;  %v157_v6 = vld [vmem:[%s4454_s1 + $0x278] sm:$0xff]  ;;  %v188_v7 = vld [vmem:[%s4454_s1 + $0x370] sm:$0xff]  ;;  %v2408_v8 = vpack.c.bf16 %v205_v1, %v204_v0  ;;  %v223_v11 = vld [vmem:[%s4454_s1 + $0x488] sm:$0xff] }
  0x2e   :  { %2361 = vmatprep.subr.bf16.mxu0 %v2360_v16  ;;  %v189_v9 = vld [vmem:[%s4454_s1 + $0x378] sm:$0xff]  ;;  %v254_v12 = vld [vmem:[%s4454_s1 + $0x580] sm:$0xff]  ;;  %v255_v13 = vld [vmem:[%s4454_s1 + $0x588] sm:$0xff]  ;;  %v2378_v14 = vpack.c.bf16 %v157_v6, %v156_v5  ;;  %v2412_v18 = vpack.c.bf16 %v223_v11, %v222_v10 }
  0x2f   :  { %2391 = vmatpush3.bf16.msra.mxu1 %v2390_v15  ;;  %v18_v15 = vld [vmem:[%s4455_s0 + $0x20] sm:$0xff]  ;;  %v2410_v17 = vpack.c.bf16 %v189_v9, %v188_v7  ;;  %v207_v19 = vld [vmem:[%s4454_s1 + $0x408] sm:$0xff]  ;;  %v2444_v22 = vpack.c.bf16 %v255_v13, %v254_v12  ;;  %v224_v24 = vld [vmem:[%s4454_s1 + $0x490] sm:$0xff] }
  0x30   :  { %2393 = vmatprep.subr.bf16.mxu1 %v2392_v20  ;;  %v206_v16 = vld [vmem:[%s4454_s1 + $0x400] sm:$0xff]  ;;  %v20_v20 = vld [vmem:[%s4455_s0 + $0x30] sm:$0xff]  ;;  %v239_v23 = vld [vmem:[%s4454_s1 + $0x508] sm:$0xff] }
  0x31   :  { %2363 = vmatpush3.bf16.msra.mxu0 %v2362_v26  ;;  %v238_v21 = vld [vmem:[%s4454_s1 + $0x500] sm:$0xff]  ;;  %v225_v25 = vld [vmem:[%s4454_s1 + $0x498] sm:$0xff]  ;;  %v50_v26 = vmax.f32 %v18_v15, 0.0  ;;  %v256_v27 = vld [vmem:[%s4454_s1 + $0x590] sm:$0xff] }
  0x32   :  { %2365 = vmatprep.subr.bf16.mxu0 %v2364_v30  ;;  %v257_v28 = vld [vmem:[%s4454_s1 + $0x598] sm:$0xff]  ;;  %v52_v30 = vmax.f32 %v20_v20, 0.0  ;;  %v208_v31 = vld [vmem:[%s4454_s1 + $0x410] sm:$0xff]  ;;  %v2446_v32 = vpack.c.bf16 %v239_v23, %v238_v21  ;;  %v2416_v33 = vpack.c.bf16 %v225_v25, %v224_v24  ;;  %v226_v38 = vld [vmem:[%s4454_s1 + $0x4a0] sm:$0xff] }
  0x33   :  { %2395 = vmatpush3.bf16.msra.mxu1 %v2394_v29  ;;  %v2414_v29 = vpack.c.bf16 %v207_v19, %v206_v16  ;;  %v209_v34 = vld [vmem:[%s4454_s1 + $0x418] sm:$0xff]  ;;  %v2448_v37 = vpack.c.bf16 %v257_v28, %v256_v27  ;;  %v227_v39 = vld [vmem:[%s4454_s1 + $0x4a8] sm:$0xff]  ;;  %v258_v41 = vld [vmem:[%s4454_s1 + $0x5a0] sm:$0xff] }
  0x34   :  { %2397 = vmatprep.subr.bf16.mxu1 %v2396_v35  ;;  %v240_v35 = vld [vmem:[%s4454_s1 + $0x510] sm:$0xff]  ;;  %v241_v36 = vld [vmem:[%s4454_s1 + $0x518] sm:$0xff]  ;;  %v23_v40 = vld [vmem:[%s4455_s0 + $0x48] sm:$0xff]  ;;  %v2420_v47 = vpack.c.bf16 %v227_v39, %v226_v38 }
  0x35   :  { %2367 = vmatpush3.bf16.msra.mxu0 %v2366_v42  ;;  %v259_v42 = vld [vmem:[%s4454_s1 + $0x5a8] sm:$0xff]  ;;  %v25_v45 = vld [vmem:[%s4455_s0 + $0x58] sm:$0xff]  ;;  %v2450_v46 = vpack.c.bf16 %v241_v36, %v240_v35  ;;  %v242_v50 = vld [vmem:[%s4454_s1 + $0x520] sm:$0xff] }
  0x36   :  { %2369 = vmatprep.subr.bf16.mxu0 %v2368_v44  ;;  %v2418_v44 = vpack.c.bf16 %v209_v34, %v208_v31  ;;  %v211_v49 = vld [vmem:[%s4454_s1 + $0x428] sm:$0xff]  ;;  %v57_v51 = vmax.f32 %v25_v45, 0.0  ;;  %v2452_v52 = vpack.c.bf16 %v259_v42, %v258_v41  ;;  %v261_v57 = vld [vmem:[%s4454_s1 + $0x5b8] sm:$0xff]  ;;  %v212_v61 = vld [vmem:[%s4454_s1 + $0x430] sm:$0xff] }
  0x37   :  { %2399 = vmatpush3.bf16.msra.mxu1 %v2398_v43  ;;  %v55_v43 = vmax.f32 %v23_v40, 0.0  ;;  %v243_v53 = vld [vmem:[%s4454_s1 + $0x528] sm:$0xff]  ;;  %v213_v62 = vld [vmem:[%s4454_s1 + $0x438] sm:$0xff]  ;;  %v244_v63 = vld [vmem:[%s4454_s1 + $0x530] sm:$0xff] }
  0x38   :  { %2401 = vmatprep.subr.bf16.mxu1 %v2400_v48  ;;  %v210_v48 = vld [vmem:[%s4454_s1 + $0x420] sm:$0xff]  ;;  %v2454_v59 = vpack.c.bf16 %v243_v53, %v242_v50  ;;  %v245_v1 = vld [vmem:[%s4454_s1 + $0x538] sm:$0xff]  ;;  %v263_v5 = vld [vmem:[%s4454_s1 + $0x5c8] sm:$0xff]  ;;  %v2426_v6 = vpack.c.bf16 %v213_v62, %v212_v61 }
  0x39   :  { %2371 = vmatpush3.bf16.msra.mxu0 %v2370_v54  ;;  %v228_v54 = vld [vmem:[%s4454_s1 + $0x4b0] sm:$0xff]  ;;  %v2422_v58 = vpack.c.bf16 %v211_v49, %v210_v48  ;;  %v2458_v7 = vpack.c.bf16 %v245_v1, %v244_v63  ;;  %v214_v9 = vld [vmem:[%s4454_s1 + $0x440] sm:$0xff]  ;;  %v215_v10 = vld [vmem:[%s4454_s1 + $0x448] sm:$0xff] }
  0x3a   :  { %2373 = vmatprep.subr.bf16.mxu0 %v2372_v56  ;;  %v260_v56 = vld [vmem:[%s4454_s1 + $0x5b0] sm:$0xff]  ;;  %v246_v11 = vld [vmem:[%s4454_s1 + $0x540] sm:$0xff]  ;;  %v247_v13 = vld [vmem:[%s4454_s1 + $0x548] sm:$0xff] }
  0x3b   :  { %2403 = vmatpush3.bf16.msra.mxu1 %v2402_v55  ;;  %v229_v55 = vld [vmem:[%s4454_s1 + $0x4b8] sm:$0xff]  ;;  %v2456_v0 = vpack.c.bf16 %v261_v57, %v260_v56  ;;  %v264_v16 = vld [vmem:[%s4454_s1 + $0x5d0] sm:$0xff]  ;;  %v2462_v19 = vpack.c.bf16 %v247_v13, %v246_v11  ;;  %v235_v27 = vld [vmem:[%s4454_s1 + $0x4e8] sm:$0xff] }
  0x3c   :  { %2405 = vmatprep.subr.bf16.mxu1 %v2404_v60  ;;  %v2424_v60 = vpack.c.bf16 %v229_v55, %v228_v54  ;;  %v233_v15 = vld [vmem:[%s4454_s1 + $0x4d8] sm:$0xff]  ;;  %v216_v21 = vld [vmem:[%s4454_s1 + $0x450] sm:$0xff]  ;;  %v266_v28 = vld [vmem:[%s4454_s1 + $0x5e0] sm:$0xff] }
  0x3d   :  { %2375 = vmatpush3.bf16.msra.mxu0 %v2374_v2  ;;  %v230_v2 = vld [vmem:[%s4454_s1 + $0x4c0] sm:$0xff]  ;;  %v248_v23 = vld [vmem:[%s4454_s1 + $0x550] sm:$0xff]  ;;  %v249_v25 = vld [vmem:[%s4454_s1 + $0x558] sm:$0xff] }
  0x3e   :  { %2377 = vmatprep.subr.bf16.mxu0 %v2376_v4  ;;  %v262_v4 = vld [vmem:[%s4454_s1 + $0x5c0] sm:$0xff]  ;;  %v2466_v31 = vpack.c.bf16 %v249_v25, %v248_v23  ;;  %v219_v34 = vld [vmem:[%s4454_s1 + $0x468] sm:$0xff]  ;;  %v236_v38 = vld [vmem:[%s4454_s1 + $0x4f0] sm:$0xff] }
  0x3f   :  { %2407 = vmatpush3.bf16.msra.mxu1 %v2406_v3  ;;  %v231_v3 = vld [vmem:[%s4454_s1 + $0x4c8] sm:$0xff]  ;;  %v2460_v12 = vpack.c.bf16 %v263_v5, %v262_v4  ;;  %v250_v35 = vld [vmem:[%s4454_s1 + $0x560] sm:$0xff]  ;;  %v237_v39 = vld [vmem:[%s4454_s1 + $0x4f8] sm:$0xff] }
  0x40   :  { %2409 = vmatprep.subr.bf16.mxu1 %v2408_v8  ;;  %v2428_v8 = vpack.c.bf16 %v231_v3, %v230_v2  ;;  %v268_v40 = vld [vmem:[%s4454_s1 + $0x5f0] sm:$0xff]  ;;  %v269_v41 = vld [vmem:[%s4454_s1 + $0x5f8] sm:$0xff]  ;;  %v286_v50 = vld [vmem:[%s4454_s1 + $0x680] sm:$0xff] }
  0x41   :  { %2379 = vmatpush3.bf16.msra.mxu0 %v2378_v14  ;;  %v232_v14 = vld [vmem:[%s4454_s1 + $0x4d0] sm:$0xff]  ;;  %v2472_v48 = vpack.c.bf16 %v269_v41, %v268_v40  ;;  %v253_v49 = vld [vmem:[%s4454_s1 + $0x578] sm:$0xff]  ;;  %v319_v53 = vld [vmem:[%s4454_s1 + $0x788] sm:$0xff] }
  0x42   :  { %2413 = vmatprep.subr.bf16.mxu0 %v2412_v18  ;;  %v2430_v18 = vpack.c.bf16 %v215_v10, %v214_v9  ;;  %v2432_v20 = vpack.c.bf16 %v233_v15, %v232_v14  ;;  %v220_v45 = vld [vmem:[%s4454_s1 + $0x470] sm:$0xff]  ;;  %v22_v55 = vld [vmem:[%s4455_s0 + $0x40] sm:$0xff]  ;;  %v303_v63 = vld [vmem:[%s4454_s1 + $0x708] sm:$0xff] }
  0x43   :  { %2411 = vmatpush3.bf16.msra.mxu1 %v2410_v17  ;;  %v265_v17 = vld [vmem:[%s4454_s1 + $0x5d8] sm:$0xff]  ;;  %v270_v56 = vld [vmem:[%s4454_s1 + $0x600] sm:$0xff]  ;;  %v54_v2 = vmax.f32 %v22_v55, 0.0  ;;  %v320_v3 = vld [vmem:[%s4454_s1 + $0x790] sm:$0xff] }
  0x44   :  { %2445 = vmatprep.subr.bf16.mxu1 %v2444_v22  ;;  %802 = vmatmul.mubr.f32.vlgmr.msra.gmra.mrb[2].mxu0 %v50_v26  ;;  %v217_v22 = vld [vmem:[%s4454_s1 + $0x458] sm:$0xff]  ;;  %v2464_v24 = vpack.c.bf16 %v265_v17, %v264_v16  ;;  %v234_v26 = vld [vmem:[%s4454_s1 + $0x4e0] sm:$0xff]  ;;  %v27_v5 = vld [vmem:[%s4455_s0 + $0x68] sm:$0xff] }
  0x45   :  { %2415 = vmatpush3.bf16.msra.mxu0 %v2414_v29  ;;  %941 = vmatprep.mubr.f32.mxu0 %v55_v43  ;;  %v267_v29 = vld [vmem:[%s4454_s1 + $0x5e8] sm:$0xff]  ;;  %v302_v61 = vld [vmem:[%s4454_s1 + $0x700] sm:$0xff]  ;;  %v289_v1 = vld [vmem:[%s4454_s1 + $0x698] sm:$0xff] }
  0x46   :  { %872 = vmatmul.mubr.f32.vlgmr.msra.gmra.mrb[2].mxu1 %v52_v30  ;;  %2417 = vmatprep.subr.bf16.mxu0 %v2416_v33  ;;  %v2434_v30 = vpack.c.bf16 %v217_v22, %v216_v21  ;;  %v218_v33 = vld [vmem:[%s4454_s1 + $0x460] sm:$0xff]  ;;  %v2468_v36 = vpack.c.bf16 %v267_v29, %v266_v28  ;;  %v321_v4 = vld [vmem:[%s4454_s1 + $0x798] sm:$0xff]  ;;  %v2510_v9 = vpack.c.bf16 %v303_v63, %v302_v61  ;;  %v272_v11 = vld [vmem:[%s4454_s1 + $0x610] sm:$0xff] }
  0x47   :  { %2447 = vmatpush3.bf16.msra.mxu1 %v2446_v32  ;;  %1011 = vmatprep.mubr.f32.mxu1 %v57_v51  ;;  %v2436_v32 = vpack.c.bf16 %v235_v27, %v234_v26  ;;  %v2438_v42 = vpack.c.bf16 %v219_v34, %v218_v33  ;;  %v287_v51 = vld [vmem:[%s4454_s1 + $0x688] sm:$0xff]  ;;  %v304_v13 = vld [vmem:[%s4454_s1 + $0x710] sm:$0xff]  ;;  %v2512_v14 = vpack.c.bf16 %v321_v4, %v320_v3  ;;  %v305_v15 = vld [vmem:[%s4454_s1 + $0x718] sm:$0xff] }
  0x48   :  { %2449 = vmatprep.subr.bf16.mxu1 %v2448_v37  ;;  %v251_v37 = vld [vmem:[%s4454_s1 + $0x568] sm:$0xff]  ;;  %v290_v16 = vld [vmem:[%s4454_s1 + $0x6a0] sm:$0xff]  ;;  %v2514_v23 = vpack.c.bf16 %v305_v15, %v304_v13  ;;  %v325_v33 = vld [vmem:[%s4454_s1 + $0x7b8] sm:$0xff] }
  0x49   :  { %2419 = vmatpush3.bf16.msra.mxu0 %v2418_v44  ;;  %v2470_v43 = vpack.c.bf16 %v251_v37, %v250_v35  ;;  %v2440_v44 = vpack.c.bf16 %v237_v39, %v236_v38  ;;  %v291_v17 = vld [vmem:[%s4454_s1 + $0x6a8] sm:$0xff]  ;;  %v274_v25 = vld [vmem:[%s4454_s1 + $0x620] sm:$0xff]  ;;  %v276_v37 = vld [vmem:[%s4454_s1 + $0x630] sm:$0xff] }
  0x4a   :  { %2421 = vmatprep.subr.bf16.mxu0 %v2420_v47  ;;  %v252_v47 = vld [vmem:[%s4454_s1 + $0x570] sm:$0xff]  ;;  %v275_v26 = vld [vmem:[%s4454_s1 + $0x628] sm:$0xff]  ;;  %v306_v27 = vld [vmem:[%s4454_s1 + $0x720] sm:$0xff] }
  0x4b   :  { %2451 = vmatpush3.bf16.msra.mxu1 %v2450_v46  ;;  %v221_v46 = vld [vmem:[%s4454_s1 + $0x478] sm:$0xff]  ;;  %v2474_v57 = vpack.c.bf16 %v253_v49, %v252_v47  ;;  %v307_v29 = vld [vmem:[%s4454_s1 + $0x728] sm:$0xff]  ;;  %v2486_v34 = vpack.c.bf16 %v275_v26, %v274_v25  ;;  %v308_v39 = vld [vmem:[%s4454_s1 + $0x730] sm:$0xff] }
  0x4c   :  { %2453 = vmatprep.subr.bf16.mxu1 %v2452_v52  ;;  %v318_v52 = vld [vmem:[%s4454_s1 + $0x780] sm:$0xff]  ;;  %v2442_v54 = vpack.c.bf16 %v221_v46, %v220_v45  ;;  %v2518_v35 = vpack.c.bf16 %v307_v29, %v306_v27  ;;  %v277_v38 = vld [vmem:[%s4454_s1 + $0x638] sm:$0xff]  ;;  %v327_v45 = vld [vmem:[%s4454_s1 + $0x7c8] sm:$0xff] }
  0x4d   :  { %2423 = vmatpush3.bf16.msra.mxu0 %v2422_v58  ;;  %v2476_v58 = vpack.c.bf16 %v287_v51, %v286_v50  ;;  %v2508_v62 = vpack.c.bf16 %v319_v53, %v318_v52  ;;  %v309_v41 = vld [vmem:[%s4454_s1 + $0x738] sm:$0xff]  ;;  %v2490_v46 = vpack.c.bf16 %v277_v38, %v276_v37  ;;  %v278_v49 = vld [vmem:[%s4454_s1 + $0x640] sm:$0xff]  ;;  %v279_v50 = vld [vmem:[%s4454_s1 + $0x648] sm:$0xff] }
  0x4e   :  { %2425 = vmatprep.subr.bf16.mxu0 %v2424_v60  ;;  %v24_v60 = vld [vmem:[%s4455_s0 + $0x50] sm:$0xff]  ;;  %v2522_v47 = vpack.c.bf16 %v309_v41, %v308_v39  ;;  %v310_v51 = vld [vmem:[%s4454_s1 + $0x740] sm:$0xff]  ;;  %v311_v53 = vld [vmem:[%s4454_s1 + $0x748] sm:$0xff] }
  0x4f   :  { %2455 = vmatpush3.bf16.msra.mxu1 %v2454_v59  ;;  %v271_v59 = vld [vmem:[%s4454_s1 + $0x608] sm:$0xff]  ;;  %v297_v55 = vld [vmem:[%s4454_s1 + $0x6d8] sm:$0xff]  ;;  %v280_v61 = vld [vmem:[%s4454_s1 + $0x650] sm:$0xff] }
  0x50   :  { %2457 = vmatprep.subr.bf16.mxu1 %v2456_v0  ;;  %v288_v0 = vld [vmem:[%s4454_s1 + $0x690] sm:$0xff]  ;;  %v299_v3 = vld [vmem:[%s4454_s1 + $0x6e8] sm:$0xff]  ;;  %v330_v4 = vld [vmem:[%s4454_s1 + $0x7e0] sm:$0xff] }
  0x51   :  { %2427 = vmatpush3.bf16.msra.mxu0 %v2426_v6  ;;  %v2478_v6 = vpack.c.bf16 %v271_v59, %v270_v56  ;;  %v2480_v10 = vpack.c.bf16 %v289_v1, %v288_v0  ;;  %v328_v56 = vld [vmem:[%s4454_s1 + $0x7d0] sm:$0xff]  ;;  %v2526_v59 = vpack.c.bf16 %v311_v53, %v310_v51  ;;  %v313_v1 = vld [vmem:[%s4454_s1 + $0x758] sm:$0xff]  ;;  %v315_v13 = vld [vmem:[%s4454_s1 + $0x768] sm:$0xff] }
  0x52   :  { %2429 = vmatprep.subr.bf16.mxu0 %v2428_v8  ;;  %v29_v8 = vld [vmem:[%s4455_s0 + $0x78] sm:$0xff]  ;;  %v312_v63 = vld [vmem:[%s4454_s1 + $0x750] sm:$0xff]  ;;  %v350_v26 = vld [vmem:[%s4454_s1 + $0x880] sm:$0xff] }
  0x53   :  { %2459 = vmatpush3.bf16.msra.mxu1 %v2458_v7  ;;  %v56_v7 = vmax.f32 %v24_v60, 0.0  ;;  %v61_v21 = vmax.f32 %v29_v8, 0.0  ;;  %v301_v15 = vld [vmem:[%s4454_s1 + $0x6f8] sm:$0xff]  ;;  %v351_v27 = vld [vmem:[%s4454_s1 + $0x888] sm:$0xff]  ;;  %v366_v37 = vld [vmem:[%s4454_s1 + $0x900] sm:$0xff] }
  0x54   :  { %2461 = vmatprep.subr.bf16.mxu1 %v2460_v12  ;;  %v273_v12 = vld [vmem:[%s4454_s1 + $0x618] sm:$0xff]  ;;  %v383_v29 = vld [vmem:[%s4454_s1 + $0x988] sm:$0xff]  ;;  %v336_v51 = vld [vmem:[%s4454_s1 + $0x810] sm:$0xff] }
  0x55   :  { %2431 = vmatpush3.bf16.msra.mxu0 %v2430_v18  ;;  %v59_v18 = vmax.f32 %v27_v5, 0.0  ;;  %v2482_v22 = vpack.c.bf16 %v273_v12, %v272_v11  ;;  %v331_v5 = vld [vmem:[%s4454_s1 + $0x7e8] sm:$0xff]  ;;  %v314_v11 = vld [vmem:[%s4454_s1 + $0x760] sm:$0xff]  ;;  %v317_v25 = vld [vmem:[%s4454_s1 + $0x778] sm:$0xff] }
  0x56   :  { %2433 = vmatprep.subr.bf16.mxu0 %v2432_v20  ;;  %v323_v20 = vld [vmem:[%s4454_s1 + $0x7a8] sm:$0xff]  ;;  %v2532_v12 = vpack.c.bf16 %v331_v5, %v330_v4  ;;  %v353_v41 = vld [vmem:[%s4454_s1 + $0x898] sm:$0xff]  ;;  %v368_v53 = vld [vmem:[%s4454_s1 + $0x910] sm:$0xff] }
  0x57   :  { %2463 = vmatpush3.bf16.msra.mxu1 %v2462_v19  ;;  %v322_v19 = vld [vmem:[%s4454_s1 + $0x7a0] sm:$0xff]  ;;  %v367_v39 = vld [vmem:[%s4454_s1 + $0x908] sm:$0xff] }
  0x58   :  { %2465 = vmatprep.subr.bf16.mxu1 %v2464_v24  ;;  %v2484_v24 = vpack.c.bf16 %v291_v17, %v290_v16  ;;  %v2516_v28 = vpack.c.bf16 %v323_v20, %v322_v19  ;;  %v332_v16 = vld [vmem:[%s4454_s1 + $0x7f0] sm:$0xff]  ;;  %v333_v17 = vld [vmem:[%s4454_s1 + $0x7f8] sm:$0xff]  ;;  %v2534_v19 = vpack.c.bf16 %v315_v13, %v314_v11  ;;  %v371_v5 = vld [vmem:[%s4454_s1 + $0x928] sm:$0xff] }
  0x59   :  { %2435 = vmatpush3.bf16.msra.mxu0 %v2434_v30  ;;  %v292_v30 = vld [vmem:[%s4454_s1 + $0x6b0] sm:$0xff] }
  0x5a   :  { %2437 = vmatprep.subr.bf16.mxu0 %v2436_v32  ;;  %v324_v32 = vld [vmem:[%s4454_s1 + $0x7b0] sm:$0xff] }
  0x5b   :  { %2467 = vmatpush3.bf16.msra.mxu1 %v2466_v31  ;;  %v293_v31 = vld [vmem:[%s4454_s1 + $0x6b8] sm:$0xff]  ;;  %v2520_v40 = vpack.c.bf16 %v325_v33, %v324_v32  ;;  %v334_v32 = vld [vmem:[%s4454_s1 + $0x800] sm:$0xff]  ;;  %v340_v13 = vld [vmem:[%s4454_s1 + $0x830] sm:$0xff] }
  0x5c   :  { %2469 = vmatprep.subr.bf16.mxu1 %v2468_v36  ;;  %v2488_v36 = vpack.c.bf16 %v293_v31, %v292_v30  ;;  %v26_v31 = vld [vmem:[%s4455_s0 + $0x60] sm:$0xff] }
  0x5d   :  { %2439 = vmatpush3.bf16.msra.mxu0 %v2438_v42  ;;  %v294_v42 = vld [vmem:[%s4454_s1 + $0x6c0] sm:$0xff] }
  0x5e   :  { %2441 = vmatprep.subr.bf16.mxu0 %v2440_v44  ;;  %v326_v44 = vld [vmem:[%s4454_s1 + $0x7c0] sm:$0xff] }
  0x5f   :  { %2471 = vmatpush3.bf16.msra.mxu1 %v2470_v43  ;;  %v295_v43 = vld [vmem:[%s4454_s1 + $0x6c8] sm:$0xff]  ;;  %v2524_v52 = vpack.c.bf16 %v327_v45, %v326_v44  ;;  %v385_v44 = vld [vmem:[%s4454_s1 + $0x998] sm:$0xff] }
  0x60   :  { %2473 = vmatprep.subr.bf16.mxu1 %v2472_v48  ;;  %v2492_v48 = vpack.c.bf16 %v295_v43, %v294_v42  ;;  %v58_v42 = vmax.f32 %v26_v31, 0.0  ;;  %v384_v43 = vld [vmem:[%s4454_s1 + $0x990] sm:$0xff]  ;;  %v31_v45 = vld [vmem:[%s4455_s0 + $0x88] sm:$0xff]  ;;  %v361_v31 = vld [vmem:[%s4454_s1 + $0x8d8] sm:$0xff] }
  0x61   :  { %2443 = vmatpush3.bf16.msra.mxu0 %v2442_v54  ;;  %v296_v54 = vld [vmem:[%s4454_s1 + $0x6d0] sm:$0xff] }
  0x62   :  { %2477 = vmatprep.subr.bf16.mxu0 %v2476_v58  ;;  %v2494_v58 = vpack.c.bf16 %v279_v50, %v278_v49  ;;  %v2496_v60 = vpack.c.bf16 %v297_v55, %v296_v54  ;;  %v2574_v49 = vpack.c.bf16 %v367_v39, %v366_v37  ;;  %v2576_v54 = vpack.c.bf16 %v385_v44, %v384_v43  ;;  %v369_v55 = vld [vmem:[%s4454_s1 + $0x918] sm:$0xff]  ;;  %v344_v37 = vld [vmem:[%s4454_s1 + $0x850] sm:$0xff]  ;;  %v363_v43 = vld [vmem:[%s4454_s1 + $0x8e8] sm:$0xff] }
  0x63   :  { %2475 = vmatpush3.bf16.msra.mxu1 %v2474_v57  ;;  %v329_v57 = vld [vmem:[%s4454_s1 + $0x7d8] sm:$0xff]  ;;  %v376_v39 = vld [vmem:[%s4454_s1 + $0x950] sm:$0xff]  ;;  %v394_v44 = vld [vmem:[%s4454_s1 + $0x9e0] sm:$0xff] }
  0x64   :  { %2509 = vmatprep.subr.bf16.mxu1 %v2508_v62  ;;  %942 = vmatmul.mubr.f32.vlgmr.msra.gmra.mrb[4].mxu0 %v54_v2  ;;  %v281_v62 = vld [vmem:[%s4454_s1 + $0x658] sm:$0xff]  ;;  %v2528_v0 = vpack.c.bf16 %v329_v57, %v328_v56  ;;  %v298_v2 = vld [vmem:[%s4454_s1 + $0x6e0] sm:$0xff]  ;;  %v355_v57 = vld [vmem:[%s4454_s1 + $0x8a8] sm:$0xff] }
  0x65   :  { %2479 = vmatpush3.bf16.msra.mxu0 %v2478_v6  ;;  %1081 = vmatprep.mubr.f32.mxu0 %v59_v18  ;;  %v2498_v6 = vpack.c.bf16 %v281_v62, %v280_v61  ;;  %v2500_v8 = vpack.c.bf16 %v299_v3, %v298_v2  ;;  %v354_v56 = vld [vmem:[%s4454_s1 + $0x8a0] sm:$0xff]  ;;  %v339_v2 = vld [vmem:[%s4454_s1 + $0x828] sm:$0xff] }
  0x66   :  { %1012 = vmatmul.mubr.f32.vlgmr.msra.gmra.mrb[4].mxu1 %v56_v7  ;;  %2481 = vmatprep.subr.bf16.mxu0 %v2480_v10  ;;  %v2530_v7 = vpack.c.bf16 %v313_v1, %v312_v63  ;;  %v283_v10 = vld [vmem:[%s4454_s1 + $0x668] sm:$0xff]  ;;  %v2578_v63 = vpack.c.bf16 %v369_v55, %v368_v53  ;;  %v338_v1 = vld [vmem:[%s4454_s1 + $0x820] sm:$0xff]  ;;  %v365_v55 = vld [vmem:[%s4454_s1 + $0x8f8] sm:$0xff] }
  0x67   :  { %2511 = vmatpush3.bf16.msra.mxu1 %v2510_v9  ;;  %1151 = vmatprep.mubr.f32.mxu1 %v61_v21  ;;  %v282_v9 = vld [vmem:[%s4454_s1 + $0x660] sm:$0xff]  ;;  %v284_v21 = vld [vmem:[%s4454_s1 + $0x670] sm:$0xff]  ;;  %v379_v53 = vld [vmem:[%s4454_s1 + $0x968] sm:$0xff] }
  0x68   :  { %2513 = vmatprep.subr.bf16.mxu1 %v2512_v14  ;;  %v300_v14 = vld [vmem:[%s4454_s1 + $0x6f0] sm:$0xff]  ;;  %v2502_v18 = vpack.c.bf16 %v283_v10, %v282_v9  ;;  %v370_v3 = vld [vmem:[%s4454_s1 + $0x920] sm:$0xff]  ;;  %v389_v9 = vld [vmem:[%s4454_s1 + $0x9b8] sm:$0xff]  ;;  %v2550_v10 = vpack.c.bf16 %v339_v2, %v338_v1 }
  0x69   :  { %2483 = vmatpush3.bf16.msra.mxu0 %v2482_v22  ;;  %v2504_v20 = vpack.c.bf16 %v301_v15, %v300_v14  ;;  %v285_v22 = vld [vmem:[%s4454_s1 + $0x678] sm:$0xff]  ;;  %v2582_v11 = vpack.c.bf16 %v371_v5, %v370_v3  ;;  %v372_v15 = vld [vmem:[%s4454_s1 + $0x930] sm:$0xff]  ;;  %v414_v2 = vld [vmem:[%s4454_s1 + $0xa80] sm:$0xff] }
  0x6a   :  { %2485 = vmatprep.subr.bf16.mxu0 %v2484_v24  ;;  %v2536_v24 = vpack.c.bf16 %v333_v17, %v332_v16  ;;  %v2506_v30 = vpack.c.bf16 %v285_v22, %v284_v21  ;;  %v341_v14 = vld [vmem:[%s4454_s1 + $0x838] sm:$0xff]  ;;  %v391_v21 = vld [vmem:[%s4454_s1 + $0x9c8] sm:$0xff] }
  0x6b   :  { %2515 = vmatpush3.bf16.msra.mxu1 %v2514_v23  ;;  %v316_v23 = vld [vmem:[%s4454_s1 + $0x770] sm:$0xff]  ;;  %v373_v17 = vld [vmem:[%s4454_s1 + $0x938] sm:$0xff]  ;;  %v2554_v22 = vpack.c.bf16 %v341_v14, %v340_v13  ;;  %v415_v3 = vld [vmem:[%s4454_s1 + $0xa88] sm:$0xff] }
  0x6c   :  { %2517 = vmatprep.subr.bf16.mxu1 %v2516_v28  ;;  %v382_v28 = vld [vmem:[%s4454_s1 + $0x980] sm:$0xff]  ;;  %v2538_v33 = vpack.c.bf16 %v317_v25, %v316_v23  ;;  %v2586_v23 = vpack.c.bf16 %v373_v17, %v372_v15  ;;  %v381_v1 = vld [vmem:[%s4454_s1 + $0x978] sm:$0xff]  ;;  %v447_v5 = vld [vmem:[%s4454_s1 + $0xb88] sm:$0xff] }
  0x6d   :  { %2487 = vmatpush3.bf16.msra.mxu0 %v2486_v34  ;;  %v2540_v34 = vpack.c.bf16 %v351_v27, %v350_v26  ;;  %v2572_v38 = vpack.c.bf16 %v383_v29, %v382_v28  ;;  %v342_v25 = vld [vmem:[%s4454_s1 + $0x840] sm:$0xff]  ;;  %v343_v26 = vld [vmem:[%s4454_s1 + $0x848] sm:$0xff]  ;;  %v417_v17 = vld [vmem:[%s4454_s1 + $0xa98] sm:$0xff] }
  0x6e   :  { %2489 = vmatprep.subr.bf16.mxu0 %v2488_v36  ;;  %v28_v36 = vld [vmem:[%s4455_s0 + $0x70] sm:$0xff]  ;;  %v374_v27 = vld [vmem:[%s4454_s1 + $0x940] sm:$0xff]  ;;  %v375_v29 = vld [vmem:[%s4454_s1 + $0x948] sm:$0xff] }
  0x6f   :  { %2519 = vmatpush3.bf16.msra.mxu1 %v2518_v35  ;;  %v335_v35 = vld [vmem:[%s4454_s1 + $0x808] sm:$0xff]  ;;  %v430_v13 = vld [vmem:[%s4454_s1 + $0xb00] sm:$0xff] }
  0x70   :  { %2521 = vmatprep.subr.bf16.mxu1 %v2520_v40  ;;  %v352_v40 = vld [vmem:[%s4454_s1 + $0x890] sm:$0xff]  ;;  %v431_v15 = vld [vmem:[%s4454_s1 + $0xb08] sm:$0xff] }
  0x71   :  { %2491 = vmatpush3.bf16.msra.mxu0 %v2490_v46  ;;  %v2542_v46 = vpack.c.bf16 %v335_v35, %v334_v32  ;;  %v2544_v50 = vpack.c.bf16 %v353_v41, %v352_v40  ;;  %v392_v32 = vld [vmem:[%s4454_s1 + $0x9d0] sm:$0xff]  ;;  %v2590_v35 = vpack.c.bf16 %v375_v29, %v374_v27  ;;  %v377_v41 = vld [vmem:[%s4454_s1 + $0x958] sm:$0xff] }
  0x72   :  { %2493 = vmatprep.subr.bf16.mxu0 %v2492_v48  ;;  %v33_v48 = vld [vmem:[%s4455_s0 + $0x98] sm:$0xff]  ;;  %v400_v27 = vld [vmem:[%s4454_s1 + $0xa10] sm:$0xff] }
  0x73   :  { %2523 = vmatpush3.bf16.msra.mxu1 %v2522_v47  ;;  %v60_v47 = vmax.f32 %v28_v36, 0.0  ;;  %v65_v61 = vmax.f32 %v33_v48, 0.0  ;;  %v432_v29 = vld [vmem:[%s4454_s1 + $0xb10] sm:$0xff] }
  0x74   :  { %2525 = vmatprep.subr.bf16.mxu1 %v2524_v52  ;;  %v337_v52 = vld [vmem:[%s4454_s1 + $0x818] sm:$0xff] }
  0x75   :  { %2495 = vmatpush3.bf16.msra.mxu0 %v2494_v58  ;;  %v63_v58 = vmax.f32 %v31_v45, 0.0  ;;  %v2546_v62 = vpack.c.bf16 %v337_v52, %v336_v51  ;;  %v395_v45 = vld [vmem:[%s4454_s1 + $0x9e8] sm:$0xff]  ;;  %v378_v51 = vld [vmem:[%s4454_s1 + $0x960] sm:$0xff] }
  0x76   :  { %2497 = vmatprep.subr.bf16.mxu0 %v2496_v60  ;;  %v387_v60 = vld [vmem:[%s4454_s1 + $0x9a8] sm:$0xff]  ;;  %v2596_v52 = vpack.c.bf16 %v395_v45, %v394_v44 }
  0x77   :  { %2527 = vmatpush3.bf16.msra.mxu1 %v2526_v59  ;;  %v386_v59 = vld [vmem:[%s4454_s1 + $0x9a0] sm:$0xff]  ;;  %v435_v45 = vld [vmem:[%s4454_s1 + $0xb28] sm:$0xff] }
  0x78   :  { %2529 = vmatprep.subr.bf16.mxu1 %v2528_v0  ;;  %v2548_v0 = vpack.c.bf16 %v355_v57, %v354_v56  ;;  %v2580_v4 = vpack.c.bf16 %v387_v60, %v386_v59  ;;  %v396_v56 = vld [vmem:[%s4454_s1 + $0x9f0] sm:$0xff]  ;;  %v397_v57 = vld [vmem:[%s4454_s1 + $0x9f8] sm:$0xff]  ;;  %v2598_v59 = vpack.c.bf16 %v379_v53, %v378_v51 }
  0x79   :  { %2499 = vmatpush3.bf16.msra.mxu0 %v2498_v6  ;;  %v356_v6 = vld [vmem:[%s4454_s1 + $0x8b0] sm:$0xff] }
  0x7a   :  { %2501 = vmatprep.subr.bf16.mxu0 %v2500_v8  ;;  %v388_v8 = vld [vmem:[%s4454_s1 + $0x9b0] sm:$0xff] }
  0x7b   :  { %2531 = vmatpush3.bf16.msra.mxu1 %v2530_v7  ;;  %v357_v7 = vld [vmem:[%s4454_s1 + $0x8b8] sm:$0xff]  ;;  %v2584_v16 = vpack.c.bf16 %v389_v9, %v388_v8  ;;  %v398_v8 = vld [vmem:[%s4454_s1 + $0xa00] sm:$0xff]  ;;  %v404_v53 = vld [vmem:[%s4454_s1 + $0xa30] sm:$0xff] }
  0x7c   :  { %2533 = vmatprep.subr.bf16.mxu1 %v2532_v12  ;;  %v2552_v12 = vpack.c.bf16 %v357_v7, %v356_v6  ;;  %v30_v7 = vld [vmem:[%s4455_s0 + $0x80] sm:$0xff] }
  0x7d   :  { %2503 = vmatpush3.bf16.msra.mxu0 %v2502_v18  ;;  %v358_v18 = vld [vmem:[%s4454_s1 + $0x8c0] sm:$0xff] }
  0x7e   :  { %2505 = vmatprep.subr.bf16.mxu0 %v2504_v20  ;;  %v390_v20 = vld [vmem:[%s4454_s1 + $0x9c0] sm:$0xff] }
  0x7f   :  { %2535 = vmatpush3.bf16.msra.mxu1 %v2534_v19  ;;  %v359_v19 = vld [vmem:[%s4454_s1 + $0x8c8] sm:$0xff]  ;;  %v2588_v28 = vpack.c.bf16 %v391_v21, %v390_v20  ;;  %v449_v20 = vld [vmem:[%s4454_s1 + $0xb98] sm:$0xff] }
  0x80   :  { %2537 = vmatprep.subr.bf16.mxu1 %v2536_v24  ;;  %v2556_v24 = vpack.c.bf16 %v359_v19, %v358_v18  ;;  %v62_v18 = vmax.f32 %v30_v7, 0.0  ;;  %v448_v19 = vld [vmem:[%s4454_s1 + $0xb90] sm:$0xff]  ;;  %v35_v21 = vld [vmem:[%s4455_s0 + $0xa8] sm:$0xff]  ;;  %v425_v7 = vld [vmem:[%s4454_s1 + $0xad8] sm:$0xff] }
  0x81   :  { %2507 = vmatpush3.bf16.msra.mxu0 %v2506_v30  ;;  %v360_v30 = vld [vmem:[%s4454_s1 + $0x8d0] sm:$0xff] }
  0x82   :  { %2541 = vmatprep.subr.bf16.mxu0 %v2540_v34  ;;  %v2558_v34 = vpack.c.bf16 %v343_v26, %v342_v25  ;;  %v2560_v36 = vpack.c.bf16 %v361_v31, %v360_v30  ;;  %v2638_v25 = vpack.c.bf16 %v431_v15, %v430_v13  ;;  %v2640_v30 = vpack.c.bf16 %v449_v20, %v448_v19  ;;  %v433_v31 = vld [vmem:[%s4454_s1 + $0xb18] sm:$0xff]  ;;  %v408_v13 = vld [vmem:[%s4454_s1 + $0xa50] sm:$0xff]  ;;  %v427_v19 = vld [vmem:[%s4454_s1 + $0xae8] sm:$0xff] }
  0x83   :  { %2539 = vmatpush3.bf16.msra.mxu1 %v2538_v33  ;;  %v393_v33 = vld [vmem:[%s4454_s1 + $0x9d8] sm:$0xff]  ;;  %v440_v15 = vld [vmem:[%s4454_s1 + $0xb50] sm:$0xff]  ;;  %v458_v20 = vld [vmem:[%s4454_s1 + $0xbe0] sm:$0xff] }
  0x84   :  { %2573 = vmatprep.subr.bf16.mxu1 %v2572_v38  ;;  %1082 = vmatmul.mubr.f32.vlgmr.msra.gmra.mrb[6].mxu0 %v58_v42  ;;  %v345_v38 = vld [vmem:[%s4454_s1 + $0x858] sm:$0xff]  ;;  %v2592_v40 = vpack.c.bf16 %v393_v33, %v392_v32  ;;  %v362_v42 = vld [vmem:[%s4454_s1 + $0x8e0] sm:$0xff]  ;;  %v419_v33 = vld [vmem:[%s4454_s1 + $0xaa8] sm:$0xff] }
  0x85   :  { %2543 = vmatpush3.bf16.msra.mxu0 %v2542_v46  ;;  %1221 = vmatprep.mubr.f32.mxu0 %v63_v58  ;;  %v2562_v46 = vpack.c.bf16 %v345_v38, %v344_v37  ;;  %v2564_v48 = vpack.c.bf16 %v363_v43, %v362_v42  ;;  %v418_v32 = vld [vmem:[%s4454_s1 + $0xaa0] sm:$0xff]  ;;  %v403_v42 = vld [vmem:[%s4454_s1 + $0xa28] sm:$0xff] }
  0x86   :  { %1152 = vmatmul.mubr.f32.vlgmr.msra.gmra.mrb[6].mxu1 %v60_v47  ;;  %2545 = vmatprep.subr.bf16.mxu0 %v2544_v50  ;;  %v2594_v47 = vpack.c.bf16 %v377_v41, %v376_v39  ;;  %v347_v50 = vld [vmem:[%s4454_s1 + $0x868] sm:$0xff]  ;;  %v2642_v39 = vpack.c.bf16 %v433_v31, %v432_v29  ;;  %v402_v41 = vld [vmem:[%s4454_s1 + $0xa20] sm:$0xff]  ;;  %v429_v31 = vld [vmem:[%s4454_s1 + $0xaf8] sm:$0xff] }
  0x87   :  { %2575 = vmatpush3.bf16.msra.mxu1 %v2574_v49  ;;  %1291 = vmatprep.mubr.f32.mxu1 %v65_v61  ;;  %v346_v49 = vld [vmem:[%s4454_s1 + $0x860] sm:$0xff]  ;;  %v348_v61 = vld [vmem:[%s4454_s1 + $0x870] sm:$0xff]  ;;  %v443_v29 = vld [vmem:[%s4454_s1 + $0xb68] sm:$0xff] }
  0x88   :  { %2577 = vmatprep.subr.bf16.mxu1 %v2576_v54  ;;  %v364_v54 = vld [vmem:[%s4454_s1 + $0x8f0] sm:$0xff]  ;;  %v2566_v58 = vpack.c.bf16 %v347_v50, %v346_v49  ;;  %v434_v43 = vld [vmem:[%s4454_s1 + $0xb20] sm:$0xff]  ;;  %v453_v49 = vld [vmem:[%s4454_s1 + $0xbb8] sm:$0xff]  ;;  %v2614_v50 = vpack.c.bf16 %v403_v42, %v402_v41 }
  0x89   :  { %2547 = vmatpush3.bf16.msra.mxu0 %v2546_v62  ;;  %v2568_v60 = vpack.c.bf16 %v365_v55, %v364_v54  ;;  %v349_v62 = vld [vmem:[%s4454_s1 + $0x878] sm:$0xff]  ;;  %v2646_v51 = vpack.c.bf16 %v435_v45, %v434_v43  ;;  %v436_v55 = vld [vmem:[%s4454_s1 + $0xb30] sm:$0xff]  ;;  %v478_v42 = vld [vmem:[%s4454_s1 + $0xc80] sm:$0xff] }
  0x8a   :  { %2549 = vmatprep.subr.bf16.mxu0 %v2548_v0  ;;  %v2600_v0 = vpack.c.bf16 %v397_v57, %v396_v56  ;;  %v2570_v6 = vpack.c.bf16 %v349_v62, %v348_v61  ;;  %v405_v54 = vld [vmem:[%s4454_s1 + $0xa38] sm:$0xff]  ;;  %v455_v61 = vld [vmem:[%s4454_s1 + $0xbc8] sm:$0xff] }
  0x8b   :  { %2579 = vmatpush3.bf16.msra.mxu1 %v2578_v63  ;;  %v380_v63 = vld [vmem:[%s4454_s1 + $0x970] sm:$0xff]  ;;  %v437_v57 = vld [vmem:[%s4454_s1 + $0xb38] sm:$0xff]  ;;  %v2618_v62 = vpack.c.bf16 %v405_v54, %v404_v53  ;;  %v479_v43 = vld [vmem:[%s4454_s1 + $0xc88] sm:$0xff] }
  0x8c   :  { %2581 = vmatprep.subr.bf16.mxu1 %v2580_v4  ;;  %v446_v4 = vld [vmem:[%s4454_s1 + $0xb80] sm:$0xff]  ;;  %v2602_v9 = vpack.c.bf16 %v381_v1, %v380_v63  ;;  %v2650_v63 = vpack.c.bf16 %v437_v57, %v436_v55  ;;  %v445_v41 = vld [vmem:[%s4454_s1 + $0xb78] sm:$0xff]  ;;  %v511_v45 = vld [vmem:[%s4454_s1 + $0xd88] sm:$0xff] }
  0x8d   :  { %2551 = vmatpush3.bf16.msra.mxu0 %v2550_v10  ;;  %v2604_v10 = vpack.c.bf16 %v415_v3, %v414_v2  ;;  %v2636_v14 = vpack.c.bf16 %v447_v5, %v446_v4  ;;  %v406_v1 = vld [vmem:[%s4454_s1 + $0xa40] sm:$0xff]  ;;  %v407_v2 = vld [vmem:[%s4454_s1 + $0xa48] sm:$0xff]  ;;  %v481_v57 = vld [vmem:[%s4454_s1 + $0xc98] sm:$0xff] }
  0x8e   :  { %2553 = vmatprep.subr.bf16.mxu0 %v2552_v12  ;;  %v32_v12 = vld [vmem:[%s4455_s0 + $0x90] sm:$0xff]  ;;  %v438_v3 = vld [vmem:[%s4454_s1 + $0xb40] sm:$0xff]  ;;  %v439_v5 = vld [vmem:[%s4454_s1 + $0xb48] sm:$0xff] }
  0x8f   :  { %2583 = vmatpush3.bf16.msra.mxu1 %v2582_v11  ;;  %v399_v11 = vld [vmem:[%s4454_s1 + $0xa08] sm:$0xff]  ;;  %v494_v53 = vld [vmem:[%s4454_s1 + $0xd00] sm:$0xff] }
  0x90   :  { %2585 = vmatprep.subr.bf16.mxu1 %v2584_v16  ;;  %v416_v16 = vld [vmem:[%s4454_s1 + $0xa90] sm:$0xff]  ;;  %v495_v55 = vld [vmem:[%s4454_s1 + $0xd08] sm:$0xff] }
  0x91   :  { %2555 = vmatpush3.bf16.msra.mxu0 %v2554_v22  ;;  %v2606_v22 = vpack.c.bf16 %v399_v11, %v398_v8  ;;  %v2608_v26 = vpack.c.bf16 %v417_v17, %v416_v16  ;;  %v456_v8 = vld [vmem:[%s4454_s1 + $0xbd0] sm:$0xff]  ;;  %v2654_v11 = vpack.c.bf16 %v439_v5, %v438_v3  ;;  %v441_v17 = vld [vmem:[%s4454_s1 + $0xb58] sm:$0xff] }
  0x92   :  { %2557 = vmatprep.subr.bf16.mxu0 %v2556_v24  ;;  %v37_v24 = vld [vmem:[%s4455_s0 + $0xb8] sm:$0xff]  ;;  %v464_v3 = vld [vmem:[%s4454_s1 + $0xc10] sm:$0xff] }
  0x93   :  { %2587 = vmatpush3.bf16.msra.mxu1 %v2586_v23  ;;  %v64_v23 = vmax.f32 %v32_v12, 0.0  ;;  %v69_v37 = vmax.f32 %v37_v24, 0.0  ;;  %v496_v5 = vld [vmem:[%s4454_s1 + $0xd10] sm:$0xff] }
  0x94   :  { %2589 = vmatprep.subr.bf16.mxu1 %v2588_v28  ;;  %v401_v28 = vld [vmem:[%s4454_s1 + $0xa18] sm:$0xff] }
  0x95   :  { %2559 = vmatpush3.bf16.msra.mxu0 %v2558_v34  ;;  %v67_v34 = vmax.f32 %v35_v21, 0.0  ;;  %v2610_v38 = vpack.c.bf16 %v401_v28, %v400_v27  ;;  %v459_v21 = vld [vmem:[%s4454_s1 + $0xbe8] sm:$0xff]  ;;  %v442_v27 = vld [vmem:[%s4454_s1 + $0xb60] sm:$0xff] }
  0x96   :  { %2561 = vmatprep.subr.bf16.mxu0 %v2560_v36  ;;  %v451_v36 = vld [vmem:[%s4454_s1 + $0xba8] sm:$0xff]  ;;  %v2660_v28 = vpack.c.bf16 %v459_v21, %v458_v20 }
  0x97   :  { %2591 = vmatpush3.bf16.msra.mxu1 %v2590_v35  ;;  %v450_v35 = vld [vmem:[%s4454_s1 + $0xba0] sm:$0xff]  ;;  %v499_v21 = vld [vmem:[%s4454_s1 + $0xd28] sm:$0xff] }
  0x98   :  { %2593 = vmatprep.subr.bf16.mxu1 %v2592_v40  ;;  %v2612_v40 = vpack.c.bf16 %v419_v33, %v418_v32  ;;  %v2644_v44 = vpack.c.bf16 %v451_v36, %v450_v35  ;;  %v460_v32 = vld [vmem:[%s4454_s1 + $0xbf0] sm:$0xff]  ;;  %v461_v33 = vld [vmem:[%s4454_s1 + $0xbf8] sm:$0xff]  ;;  %v2662_v35 = vpack.c.bf16 %v443_v29, %v442_v27 }
  0x99   :  { %2563 = vmatpush3.bf16.msra.mxu0 %v2562_v46  ;;  %v420_v46 = vld [vmem:[%s4454_s1 + $0xab0] sm:$0xff] }
  0x9a   :  { %2565 = vmatprep.subr.bf16.mxu0 %v2564_v48  ;;  %v452_v48 = vld [vmem:[%s4454_s1 + $0xbb0] sm:$0xff] }
  0x9b   :  { %2595 = vmatpush3.bf16.msra.mxu1 %v2594_v47  ;;  %v421_v47 = vld [vmem:[%s4454_s1 + $0xab8] sm:$0xff]  ;;  %v2648_v56 = vpack.c.bf16 %v453_v49, %v452_v48  ;;  %v462_v48 = vld [vmem:[%s4454_s1 + $0xc00] sm:$0xff]  ;;  %v468_v29 = vld [vmem:[%s4454_s1 + $0xc30] sm:$0xff] }
  0x9c   :  { %2597 = vmatprep.subr.bf16.mxu1 %v2596_v52  ;;  %v2616_v52 = vpack.c.bf16 %v421_v47, %v420_v46  ;;  %v34_v47 = vld [vmem:[%s4455_s0 + $0xa0] sm:$0xff] }
  0x9d   :  { %2567 = vmatpush3.bf16.msra.mxu0 %v2566_v58  ;;  %v422_v58 = vld [vmem:[%s4454_s1 + $0xac0] sm:$0xff] }
  0x9e   :  { %2569 = vmatprep.subr.bf16.mxu0 %v2568_v60  ;;  %v454_v60 = vld [vmem:[%s4454_s1 + $0xbc0] sm:$0xff] }
  0x9f   :  { %2599 = vmatpush3.bf16.msra.mxu1 %v2598_v59  ;;  %v423_v59 = vld [vmem:[%s4454_s1 + $0xac8] sm:$0xff]  ;;  %v2652_v4 = vpack.c.bf16 %v455_v61, %v454_v60  ;;  %v513_v60 = vld [vmem:[%s4454_s1 + $0xd98] sm:$0xff] }
  0xa0   :  { %2601 = vmatprep.subr.bf16.mxu1 %v2600_v0  ;;  %v2620_v0 = vpack.c.bf16 %v423_v59, %v422_v58  ;;  %v66_v58 = vmax.f32 %v34_v47, 0.0  ;;  %v512_v59 = vld [vmem:[%s4454_s1 + $0xd90] sm:$0xff]  ;;  %v39_v61 = vld [vmem:[%s4455_s0 + $0xc8] sm:$0xff]  ;;  %v489_v47 = vld [vmem:[%s4454_s1 + $0xcd8] sm:$0xff] }
  0xa1   :  { %2571 = vmatpush3.bf16.msra.mxu0 %v2570_v6  ;;  %v424_v6 = vld [vmem:[%s4454_s1 + $0xad0] sm:$0xff] }
  0xa2   :  { %2605 = vmatprep.subr.bf16.mxu0 %v2604_v10  ;;  %v2622_v10 = vpack.c.bf16 %v407_v2, %v406_v1  ;;  %v2624_v12 = vpack.c.bf16 %v425_v7, %v424_v6  ;;  %v2702_v1 = vpack.c.bf16 %v495_v55, %v494_v53  ;;  %v2704_v6 = vpack.c.bf16 %v513_v60, %v512_v59  ;;  %v497_v7 = vld [vmem:[%s4454_s1 + $0xd18] sm:$0xff]  ;;  %v472_v53 = vld [vmem:[%s4454_s1 + $0xc50] sm:$0xff]  ;;  %v491_v59 = vld [vmem:[%s4454_s1 + $0xce8] sm:$0xff] }
  0xa3   :  { %2603 = vmatpush3.bf16.msra.mxu1 %v2602_v9  ;;  %v457_v9 = vld [vmem:[%s4454_s1 + $0xbd8] sm:$0xff]  ;;  %v504_v55 = vld [vmem:[%s4454_s1 + $0xd50] sm:$0xff]  ;;  %v522_v60 = vld [vmem:[%s4454_s1 + $0xde0] sm:$0xff] }
  0xa4   :  { %2637 = vmatprep.subr.bf16.mxu1 %v2636_v14  ;;  %1222 = vmatmul.mubr.f32.vlgmr.msra.gmra.mrb[8].mxu0 %v62_v18  ;;  %v409_v14 = vld [vmem:[%s4454_s1 + $0xa58] sm:$0xff]  ;;  %v2656_v16 = vpack.c.bf16 %v457_v9, %v456_v8  ;;  %v426_v18 = vld [vmem:[%s4454_s1 + $0xae0] sm:$0xff]  ;;  %v483_v9 = vld [vmem:[%s4454_s1 + $0xca8] sm:$0xff] }
  0xa5   :  { %2607 = vmatpush3.bf16.msra.mxu0 %v2606_v22  ;;  %1361 = vmatprep.mubr.f32.mxu0 %v67_v34  ;;  %v2626_v22 = vpack.c.bf16 %v409_v14, %v408_v13  ;;  %v2628_v24 = vpack.c.bf16 %v427_v19, %v426_v18  ;;  %v482_v8 = vld [vmem:[%s4454_s1 + $0xca0] sm:$0xff]  ;;  %v467_v18 = vld [vmem:[%s4454_s1 + $0xc28] sm:$0xff] }
  0xa6   :  { %1292 = vmatmul.mubr.f32.vlgmr.msra.gmra.mrb[8].mxu1 %v64_v23  ;;  %2609 = vmatprep.subr.bf16.mxu0 %v2608_v26  ;;  %v2658_v23 = vpack.c.bf16 %v441_v17, %v440_v15  ;;  %v411_v26 = vld [vmem:[%s4454_s1 + $0xa68] sm:$0xff]  ;;  %v2706_v15 = vpack.c.bf16 %v497_v7, %v496_v5  ;;  %v466_v17 = vld [vmem:[%s4454_s1 + $0xc20] sm:$0xff]  ;;  %v493_v7 = vld [vmem:[%s4454_s1 + $0xcf8] sm:$0xff] }
  0xa7   :  { %2639 = vmatpush3.bf16.msra.mxu1 %v2638_v25  ;;  %1431 = vmatprep.mubr.f32.mxu1 %v69_v37  ;;  %v410_v25 = vld [vmem:[%s4454_s1 + $0xa60] sm:$0xff]  ;;  %v412_v37 = vld [vmem:[%s4454_s1 + $0xa70] sm:$0xff]  ;;  %v507_v5 = vld [vmem:[%s4454_s1 + $0xd68] sm:$0xff] }
  0xa8   :  { %2641 = vmatprep.subr.bf16.mxu1 %v2640_v30  ;;  %v428_v30 = vld [vmem:[%s4454_s1 + $0xaf0] sm:$0xff]  ;;  %v2630_v34 = vpack.c.bf16 %v411_v26, %v410_v25  ;;  %v498_v19 = vld [vmem:[%s4454_s1 + $0xd20] sm:$0xff]  ;;  %v517_v25 = vld [vmem:[%s4454_s1 + $0xdb8] sm:$0xff]  ;;  %v2678_v26 = vpack.c.bf16 %v467_v18, %v466_v17 }
  0xa9   :  { %2611 = vmatpush3.bf16.msra.mxu0 %v2610_v38  ;;  %v2632_v36 = vpack.c.bf16 %v429_v31, %v428_v30  ;;  %v413_v38 = vld [vmem:[%s4454_s1 + $0xa78] sm:$0xff]  ;;  %v2710_v27 = vpack.c.bf16 %v499_v21, %v498_v19  ;;  %v500_v31 = vld [vmem:[%s4454_s1 + $0xd30] sm:$0xff]  ;;  %v542_v18 = vld [vmem:[%s4454_s1 + $0xe80] sm:$0xff] }
  0xaa   :  { %2613 = vmatprep.subr.bf16.mxu0 %v2612_v40  ;;  %v2664_v40 = vpack.c.bf16 %v461_v33, %v460_v32  ;;  %v2634_v46 = vpack.c.bf16 %v413_v38, %v412_v37  ;;  %v469_v30 = vld [vmem:[%s4454_s1 + $0xc38] sm:$0xff]  ;;  %v519_v37 = vld [vmem:[%s4454_s1 + $0xdc8] sm:$0xff] }
  0xab   :  { %2643 = vmatpush3.bf16.msra.mxu1 %v2642_v39  ;;  %v444_v39 = vld [vmem:[%s4454_s1 + $0xb70] sm:$0xff]  ;;  %v501_v33 = vld [vmem:[%s4454_s1 + $0xd38] sm:$0xff]  ;;  %v2682_v38 = vpack.c.bf16 %v469_v30, %v468_v29  ;;  %v543_v19 = vld [vmem:[%s4454_s1 + $0xe88] sm:$0xff] }
  0xac   :  { %2645 = vmatprep.subr.bf16.mxu1 %v2644_v44  ;;  %v510_v44 = vld [vmem:[%s4454_s1 + $0xd80] sm:$0xff]  ;;  %v2666_v49 = vpack.c.bf16 %v445_v41, %v444_v39  ;;  %v2714_v39 = vpack.c.bf16 %v501_v33, %v500_v31  ;;  %v509_v17 = vld [vmem:[%s4454_s1 + $0xd78] sm:$0xff]  ;;  %v575_v21 = vld [vmem:[%s4454_s1 + $0xf88] sm:$0xff] }
  0xad   :  { %2615 = vmatpush3.bf16.msra.mxu0 %v2614_v50  ;;  %v2668_v50 = vpack.c.bf16 %v479_v43, %v478_v42  ;;  %v2700_v54 = vpack.c.bf16 %v511_v45, %v510_v44  ;;  %v470_v41 = vld [vmem:[%s4454_s1 + $0xc40] sm:$0xff]  ;;  %v471_v42 = vld [vmem:[%s4454_s1 + $0xc48] sm:$0xff]  ;;  %v545_v33 = vld [vmem:[%s4454_s1 + $0xe98] sm:$0xff] }
  0xae   :  { %2617 = vmatprep.subr.bf16.mxu0 %v2616_v52  ;;  %v36_v52 = vld [vmem:[%s4455_s0 + $0xb0] sm:$0xff]  ;;  %v502_v43 = vld [vmem:[%s4454_s1 + $0xd40] sm:$0xff]  ;;  %v503_v45 = vld [vmem:[%s4454_s1 + $0xd48] sm:$0xff] }
  0xaf   :  { %2647 = vmatpush3.bf16.msra.mxu1 %v2646_v51  ;;  %v463_v51 = vld [vmem:[%s4454_s1 + $0xc08] sm:$0xff]  ;;  %v558_v29 = vld [vmem:[%s4454_s1 + $0xf00] sm:$0xff] }
  0xb0   :  { %2649 = vmatprep.subr.bf16.mxu1 %v2648_v56  ;;  %v480_v56 = vld [vmem:[%s4454_s1 + $0xc90] sm:$0xff]  ;;  %v559_v31 = vld [vmem:[%s4454_s1 + $0xf08] sm:$0xff] }
  0xb1   :  { %2619 = vmatpush3.bf16.msra.mxu0 %v2618_v62  ;;  %v2670_v62 = vpack.c.bf16 %v463_v51, %v462_v48  ;;  %v2672_v2 = vpack.c.bf16 %v481_v57, %v480_v56  ;;  %v520_v48 = vld [vmem:[%s4454_s1 + $0xdd0] sm:$0xff]  ;;  %v2718_v51 = vpack.c.bf16 %v503_v45, %v502_v43  ;;  %v505_v57 = vld [vmem:[%s4454_s1 + $0xd58] sm:$0xff] }
  0xb2   :  { %2621 = vmatprep.subr.bf16.mxu0 %v2620_v0  ;;  %v41_v0 = vld [vmem:[%s4455_s0 + $0xd8] sm:$0xff]  ;;  %v528_v43 = vld [vmem:[%s4454_s1 + $0xe10] sm:$0xff] }
  0xb3   :  { %2651 = vmatpush3.bf16.msra.mxu1 %v2650_v63  ;;  %v68_v63 = vmax.f32 %v36_v52, 0.0  ;;  %v73_v13 = vmax.f32 %v41_v0, 0.0  ;;  %v560_v45 = vld [vmem:[%s4454_s1 + $0xf10] sm:$0xff] }
  0xb4   :  { %2653 = vmatprep.subr.bf16.mxu1 %v2652_v4  ;;  %v465_v4 = vld [vmem:[%s4454_s1 + $0xc18] sm:$0xff] }
  0xb5   :  { %2623 = vmatpush3.bf16.msra.mxu0 %v2622_v10  ;;  %v71_v10 = vmax.f32 %v39_v61, 0.0  ;;  %v2674_v14 = vpack.c.bf16 %v465_v4, %v464_v3  ;;  %v523_v61 = vld [vmem:[%s4454_s1 + $0xde8] sm:$0xff]  ;;  %v506_v3 = vld [vmem:[%s4454_s1 + $0xd60] sm:$0xff] }
  0xb6   :  { %2625 = vmatprep.subr.bf16.mxu0 %v2624_v12  ;;  %v515_v12 = vld [vmem:[%s4454_s1 + $0xda8] sm:$0xff]  ;;  %v2724_v4 = vpack.c.bf16 %v523_v61, %v522_v60 }
  0xb7   :  { %2655 = vmatpush3.bf16.msra.mxu1 %v2654_v11  ;;  %v514_v11 = vld [vmem:[%s4454_s1 + $0xda0] sm:$0xff]  ;;  %v563_v61 = vld [vmem:[%s4454_s1 + $0xf28] sm:$0xff] }
  0xb8   :  { %2657 = vmatprep.subr.bf16.mxu1 %v2656_v16  ;;  %v2676_v16 = vpack.c.bf16 %v483_v9, %v482_v8  ;;  %v2708_v20 = vpack.c.bf16 %v515_v12, %v514_v11  ;;  %v524_v8 = vld [vmem:[%s4454_s1 + $0xdf0] sm:$0xff]  ;;  %v525_v9 = vld [vmem:[%s4454_s1 + $0xdf8] sm:$0xff]  ;;  %v2726_v11 = vpack.c.bf16 %v507_v5, %v506_v3 }
  0xb9   :  { %2627 = vmatpush3.bf16.msra.mxu0 %v2626_v22  ;;  %v484_v22 = vld [vmem:[%s4454_s1 + $0xcb0] sm:$0xff] }
  0xba   :  { %2629 = vmatprep.subr.bf16.mxu0 %v2628_v24  ;;  %v516_v24 = vld [vmem:[%s4454_s1 + $0xdb0] sm:$0xff] }
  0xbb   :  { %2659 = vmatpush3.bf16.msra.mxu1 %v2658_v23  ;;  %v485_v23 = vld [vmem:[%s4454_s1 + $0xcb8] sm:$0xff]  ;;  %v2712_v32 = vpack.c.bf16 %v517_v25, %v516_v24  ;;  %v526_v24 = vld [vmem:[%s4454_s1 + $0xe00] sm:$0xff]  ;;  %v532_v5 = vld [vmem:[%s4454_s1 + $0xe30] sm:$0xff] }
  0xbc   :  { %2661 = vmatprep.subr.bf16.mxu1 %v2660_v28  ;;  %v2680_v28 = vpack.c.bf16 %v485_v23, %v484_v22  ;;  %v38_v23 = vld [vmem:[%s4455_s0 + $0xc0] sm:$0xff] }
  0xbd   :  { %2631 = vmatpush3.bf16.msra.mxu0 %v2630_v34  ;;  %v486_v34 = vld [vmem:[%s4454_s1 + $0xcc0] sm:$0xff] }
  0xbe   :  { %2633 = vmatprep.subr.bf16.mxu0 %v2632_v36  ;;  %v518_v36 = vld [vmem:[%s4454_s1 + $0xdc0] sm:$0xff] }
  0xbf   :  { %2663 = vmatpush3.bf16.msra.mxu1 %v2662_v35  ;;  %v487_v35 = vld [vmem:[%s4454_s1 + $0xcc8] sm:$0xff]  ;;  %v2716_v44 = vpack.c.bf16 %v519_v37, %v518_v36  ;;  %v577_v36 = vld [vmem:[%s4454_s1 + $0xf98] sm:$0xff] }
  0xc0   :  { %2665 = vmatprep.subr.bf16.mxu1 %v2664_v40  ;;  %v2684_v40 = vpack.c.bf16 %v487_v35, %v486_v34  ;;  %v70_v34 = vmax.f32 %v38_v23, 0.0  ;;  %v576_v35 = vld [vmem:[%s4454_s1 + $0xf90] sm:$0xff]  ;;  %v43_v37 = vld [vmem:[%s4455_s0 + $0xe8] sm:$0xff]  ;;  %v553_v23 = vld [vmem:[%s4454_s1 + $0xed8] sm:$0xff] }
  0xc1   :  { %2635 = vmatpush3.bf16.msra.mxu0 %v2634_v46  ;;  %v488_v46 = vld [vmem:[%s4454_s1 + $0xcd0] sm:$0xff] }
  0xc2   :  { %2669 = vmatprep.subr.bf16.mxu0 %v2668_v50  ;;  %v2686_v50 = vpack.c.bf16 %v471_v42, %v470_v41  ;;  %v2688_v52 = vpack.c.bf16 %v489_v47, %v488_v46  ;;  %v2766_v41 = vpack.c.bf16 %v559_v31, %v558_v29  ;;  %v2768_v46 = vpack.c.bf16 %v577_v36, %v576_v35  ;;  %v561_v47 = vld [vmem:[%s4454_s1 + $0xf18] sm:$0xff]  ;;  %v536_v29 = vld [vmem:[%s4454_s1 + $0xe50] sm:$0xff]  ;;  %v555_v35 = vld [vmem:[%s4454_s1 + $0xee8] sm:$0xff] }
  0xc3   :  { %2667 = vmatpush3.bf16.msra.mxu1 %v2666_v49  ;;  %v521_v49 = vld [vmem:[%s4454_s1 + $0xdd8] sm:$0xff]  ;;  %v568_v31 = vld [vmem:[%s4454_s1 + $0xf50] sm:$0xff]  ;;  %v586_v36 = vld [vmem:[%s4454_s1 + $0xfe0] sm:$0xff] }
  0xc4   :  { %2701 = vmatprep.subr.bf16.mxu1 %v2700_v54  ;;  %1362 = vmatmul.mubr.f32.vlgmr.msra.gmra.mrb[10].mxu0 %v66_v58  ;;  %v473_v54 = vld [vmem:[%s4454_s1 + $0xc58] sm:$0xff]  ;;  %v2720_v56 = vpack.c.bf16 %v521_v49, %v520_v48  ;;  %v490_v58 = vld [vmem:[%s4454_s1 + $0xce0] sm:$0xff]  ;;  %v547_v49 = vld [vmem:[%s4454_s1 + $0xea8] sm:$0xff] }
  0xc5   :  { %2671 = vmatpush3.bf16.msra.mxu0 %v2670_v62  ;;  %1501 = vmatprep.mubr.f32.mxu0 %v71_v10  ;;  %v2690_v62 = vpack.c.bf16 %v473_v54, %v472_v53  ;;  %v2692_v0 = vpack.c.bf16 %v491_v59, %v490_v58  ;;  %v546_v48 = vld [vmem:[%s4454_s1 + $0xea0] sm:$0xff]  ;;  %v531_v58 = vld [vmem:[%s4454_s1 + $0xe28] sm:$0xff] }
  0xc6   :  { %1432 = vmatmul.mubr.f32.vlgmr.msra.gmra.mrb[10].mxu1 %v68_v63  ;;  %2673 = vmatprep.subr.bf16.mxu0 %v2672_v2  ;;  %v2722_v63 = vpack.c.bf16 %v505_v57, %v504_v55  ;;  %v475_v2 = vld [vmem:[%s4454_s1 + $0xc68] sm:$0xff]  ;;  %v2770_v55 = vpack.c.bf16 %v561_v47, %v560_v45  ;;  %v530_v57 = vld [vmem:[%s4454_s1 + $0xe20] sm:$0xff]  ;;  %v556_v47 = vld [vmem:[%s4454_s1 + $0xef0] sm:$0xff] }
  0xc7   :  { %2703 = vmatpush3.bf16.msra.mxu1 %v2702_v1  ;;  %1571 = vmatprep.mubr.f32.mxu1 %v73_v13  ;;  %v474_v1 = vld [vmem:[%s4454_s1 + $0xc60] sm:$0xff]  ;;  %v476_v13 = vld [vmem:[%s4454_s1 + $0xc70] sm:$0xff] }
  0xc8   :  { %2705 = vmatprep.subr.bf16.mxu1 %v2704_v6  ;;  %v492_v6 = vld [vmem:[%s4454_s1 + $0xcf0] sm:$0xff]  ;;  %v2694_v10 = vpack.c.bf16 %v475_v2, %v474_v1  ;;  %v562_v59 = vld [vmem:[%s4454_s1 + $0xf20] sm:$0xff]  ;;  %v581_v1 = vld [vmem:[%s4454_s1 + $0xfb8] sm:$0xff]  ;;  %v2742_v2 = vpack.c.bf16 %v531_v58, %v530_v57 }
  0xc9   :  { %2675 = vmatpush3.bf16.msra.mxu0 %v2674_v14  ;;  %v2696_v12 = vpack.c.bf16 %v493_v7, %v492_v6  ;;  %v477_v14 = vld [vmem:[%s4454_s1 + $0xc78] sm:$0xff]  ;;  %v2774_v3 = vpack.c.bf16 %v563_v61, %v562_v59  ;;  %v564_v7 = vld [vmem:[%s4454_s1 + $0xf30] sm:$0xff] }
  0xca   :  { %2677 = vmatprep.subr.bf16.mxu0 %v2676_v16  ;;  %v2728_v16 = vpack.c.bf16 %v525_v9, %v524_v8  ;;  %v2698_v22 = vpack.c.bf16 %v477_v14, %v476_v13  ;;  %v533_v6 = vld [vmem:[%s4454_s1 + $0xe38] sm:$0xff]  ;;  %v583_v13 = vld [vmem:[%s4454_s1 + $0xfc8] sm:$0xff] }
  0xcb   :  { %2707 = vmatpush3.bf16.msra.mxu1 %v2706_v15  ;;  %v508_v15 = vld [vmem:[%s4454_s1 + $0xd70] sm:$0xff]  ;;  %v565_v9 = vld [vmem:[%s4454_s1 + $0xf38] sm:$0xff]  ;;  %v2746_v14 = vpack.c.bf16 %v533_v6, %v532_v5 }
  0xcc   :  { %2709 = vmatprep.subr.bf16.mxu1 %v2708_v20  ;;  %v574_v20 = vld [vmem:[%s4454_s1 + $0xf80] sm:$0xff]  ;;  %v2730_v25 = vpack.c.bf16 %v509_v17, %v508_v15  ;;  %v2778_v15 = vpack.c.bf16 %v565_v9, %v564_v7  ;;  %v541_v61 = vld [vmem:[%s4454_s1 + $0xe78] sm:$0xff]  ;;  %v44_v6 = vld [vmem:[%s4455_s0 + $0xf0] sm:$0xff] }
  0xcd   :  { %2679 = vmatpush3.bf16.msra.mxu0 %v2678_v26  ;;  %v2732_v26 = vpack.c.bf16 %v543_v19, %v542_v18  ;;  %v2764_v30 = vpack.c.bf16 %v575_v21, %v574_v20  ;;  %v534_v17 = vld [vmem:[%s4454_s1 + $0xe40] sm:$0xff]  ;;  %v535_v18 = vld [vmem:[%s4454_s1 + $0xe48] sm:$0xff] }
  0xce   :  { %2681 = vmatprep.subr.bf16.mxu0 %v2680_v28  ;;  %v40_v28 = vld [vmem:[%s4455_s0 + $0xd0] sm:$0xff]  ;;  %v566_v19 = vld [vmem:[%s4454_s1 + $0xf40] sm:$0xff]  ;;  %v567_v21 = vld [vmem:[%s4454_s1 + $0xf48] sm:$0xff] }
  0xcf   :  { %2711 = vmatpush3.bf16.msra.mxu1 %v2710_v27  ;;  %v527_v27 = vld [vmem:[%s4454_s1 + $0xe08] sm:$0xff] }
  0xd0   :  { %2713 = vmatprep.subr.bf16.mxu1 %v2712_v32  ;;  %v544_v32 = vld [vmem:[%s4454_s1 + $0xe90] sm:$0xff] }
  0xd1   :  { %2683 = vmatpush3.bf16.msra.mxu0 %v2682_v38  ;;  %v2734_v38 = vpack.c.bf16 %v527_v27, %v526_v24  ;;  %v2736_v42 = vpack.c.bf16 %v545_v33, %v544_v32  ;;  %v584_v24 = vld [vmem:[%s4454_s1 + $0xfd0] sm:$0xff]  ;;  %v2782_v27 = vpack.c.bf16 %v567_v21, %v566_v19  ;;  %v569_v33 = vld [vmem:[%s4454_s1 + $0xf58] sm:$0xff] }
  0xd2   :  { %2685 = vmatprep.subr.bf16.mxu0 %v2684_v40  ;;  %v45_v40 = vld [vmem:[%s4455_s0 + $0xf8] sm:$0xff] }
  0xd3   :  { %2715 = vmatpush3.bf16.msra.mxu1 %v2714_v39  ;;  %v72_v39 = vmax.f32 %v40_v28, 0.0  ;;  %v77_v53 = vmax.f32 %v45_v40, 0.0 }
  0xd4   :  { %2717 = vmatprep.subr.bf16.mxu1 %v2716_v44  ;;  %v529_v44 = vld [vmem:[%s4454_s1 + $0xe18] sm:$0xff] }
  0xd5   :  { %2687 = vmatpush3.bf16.msra.mxu0 %v2686_v50  ;;  %v75_v50 = vmax.f32 %v43_v37, 0.0  ;;  %v2738_v54 = vpack.c.bf16 %v529_v44, %v528_v43  ;;  %v587_v37 = vld [vmem:[%s4454_s1 + $0xfe8] sm:$0xff]  ;;  %v570_v43 = vld [vmem:[%s4454_s1 + $0xf60] sm:$0xff] }
  0xd6   :  { %2689 = vmatprep.subr.bf16.mxu0 %v2688_v52  ;;  %v579_v52 = vld [vmem:[%s4454_s1 + $0xfa8] sm:$0xff]  ;;  %v2788_v45 = vpack.c.bf16 %v587_v37, %v586_v36 }
  0xd7   :  { %2719 = vmatpush3.bf16.msra.mxu1 %v2718_v51  ;;  %v578_v51 = vld [vmem:[%s4454_s1 + $0xfa0] sm:$0xff] }
  0xd8   :  { %2721 = vmatprep.subr.bf16.mxu1 %v2720_v56  ;;  %v2740_v56 = vpack.c.bf16 %v547_v49, %v546_v48  ;;  %v2772_v60 = vpack.c.bf16 %v579_v52, %v578_v51  ;;  %v557_v48 = vld [vmem:[%s4454_s1 + $0xef8] sm:$0xff]  ;;  %v1723_v49 = vld [vmem:[%s4456_s2] ss:$0 sm:$0xff]  ;;  %v588_v52 = vld [vmem:[%s4454_s1 + $0xff0] sm:$0xff] }
  0xd9   :  { %2691 = vmatpush3.bf16.msra.mxu0 %v2690_v62  ;;  %v548_v62 = vld [vmem:[%s4454_s1 + $0xeb0] sm:$0xff]  ;;  %v2760_v59 = vpack.c.bf16 %v557_v48, %v556_v47 }
  0xda   :  { %2693 = vmatprep.subr.bf16.mxu0 %v2692_v0  ;;  %v580_v0 = vld [vmem:[%s4454_s1 + $0xfb0] sm:$0xff] }
  0xdb   :  { %2723 = vmatpush3.bf16.msra.mxu1 %v2722_v63  ;;  %v549_v63 = vld [vmem:[%s4454_s1 + $0xeb8] sm:$0xff]  ;;  %v2776_v8 = vpack.c.bf16 %v581_v1, %v580_v0  ;;  %v572_v0 = vld [vmem:[%s4454_s1 + $0xf70] sm:$0xff] }
  0xdc   :  { %2725 = vmatprep.subr.bf16.mxu1 %v2724_v4  ;;  %v2744_v4 = vpack.c.bf16 %v549_v63, %v548_v62  ;;  %v573_v1 = vld [vmem:[%s4454_s1 + $0xf78] sm:$0xff] }
  0xdd   :  { %2695 = vmatpush3.bf16.msra.mxu0 %v2694_v10  ;;  %v550_v10 = vld [vmem:[%s4454_s1 + $0xec0] sm:$0xff]  ;;  %v2794_v5 = vpack.c.bf16 %v573_v1, %v572_v0 }
  0xde   :  { %2697 = vmatprep.subr.bf16.mxu0 %v2696_v12  ;;  %v582_v12 = vld [vmem:[%s4454_s1 + $0xfc0] sm:$0xff] }
  0xdf   :  { %2727 = vmatpush3.bf16.msra.mxu1 %v2726_v11  ;;  %v551_v11 = vld [vmem:[%s4454_s1 + $0xec8] sm:$0xff]  ;;  %v2780_v20 = vpack.c.bf16 %v583_v13, %v582_v12 }
  0xe0   :  { %2729 = vmatprep.subr.bf16.mxu1 %v2728_v16  ;;  %v2748_v16 = vpack.c.bf16 %v551_v11, %v550_v10 }
  0xe1   :  { %2699 = vmatpush3.bf16.msra.mxu0 %v2698_v22  ;;  %v552_v22 = vld [vmem:[%s4454_s1 + $0xed0] sm:$0xff] }
  0xe2   :  { %2733 = vmatprep.subr.bf16.mxu0 %v2732_v26  ;;  %v2750_v26 = vpack.c.bf16 %v535_v18, %v534_v17  ;;  %v2752_v28 = vpack.c.bf16 %v553_v23, %v552_v22 }
  0xe3   :  { %2731 = vmatpush3.bf16.msra.mxu1 %v2730_v25  ;;  %v585_v25 = vld [vmem:[%s4454_s1 + $0xfd8] sm:$0xff] }
  0xe4   :  { %2765 = vmatprep.subr.bf16.mxu1 %v2764_v30  ;;  %1502 = vmatmul.mubr.f32.vlgmr.msra.gmra.mrb[12].mxu0 %v70_v34  ;;  %v537_v30 = vld [vmem:[%s4454_s1 + $0xe58] sm:$0xff]  ;;  %v2784_v32 = vpack.c.bf16 %v585_v25, %v584_v24  ;;  %v554_v34 = vld [vmem:[%s4454_s1 + $0xee0] sm:$0xff] }
  0xe5   :  { %2735 = vmatpush3.bf16.msra.mxu0 %v2734_v38  ;;  %1641 = vmatprep.mubr.f32.mxu0 %v75_v50  ;;  %v2754_v38 = vpack.c.bf16 %v537_v30, %v536_v29  ;;  %v2756_v40 = vpack.c.bf16 %v555_v35, %v554_v34 }
  0xe6   :  { %1572 = vmatmul.mubr.f32.vlgmr.msra.gmra.mrb[12].mxu1 %v72_v39  ;;  %2737 = vmatprep.subr.bf16.mxu0 %v2736_v42  ;;  %v2786_v39 = vpack.c.bf16 %v569_v33, %v568_v31  ;;  %v539_v42 = vld [vmem:[%s4454_s1 + $0xe68] sm:$0xff] }
  0xe7   :  { %2767 = vmatpush3.bf16.msra.mxu1 %v2766_v41  ;;  %1711 = vmatprep.mubr.f32.mxu1 %v77_v53  ;;  %v538_v41 = vld [vmem:[%s4454_s1 + $0xe60] sm:$0xff]  ;;  %v589_v53 = vld [vmem:[%s4454_s1 + $0xff8] sm:$0xff] }
  0xe8   :  { %2769 = vmatprep.subr.bf16.mxu1 %v2768_v46  ;;  %v571_v46 = vld [vmem:[%s4454_s1 + $0xf68] sm:$0xff]  ;;  %v2792_v63 = vpack.c.bf16 %v589_v53, %v588_v52 }
  0xe9   :  { %2739 = vmatpush3.bf16.msra.mxu0 %v2738_v54  ;;  %v2790_v58 = vpack.c.bf16 %v571_v46, %v570_v43 }
  0xea   :  { %2741 = vmatprep.subr.bf16.mxu0 %v2740_v56  ;;  %v2758_v56 = vpack.c.bf16 %v539_v42, %v538_v41 }
  0xeb   :  { %2771 = vmatpush3.bf16.msra.mxu1 %v2770_v55 }
  0xec   :  { %2773 = vmatprep.subr.bf16.mxu1 %v2772_v60  ;;  %v540_v60 = vld [vmem:[%s4454_s1 + $0xe70] sm:$0xff] }
  0xed   :  { %2743 = vmatpush3.bf16.msra.mxu0 %v2742_v2 }
  0xee   :  { %2745 = vmatprep.subr.bf16.mxu0 %v2744_v4  ;;  %v42_v4 = vld [vmem:[%s4455_s0 + $0xe0] sm:$0xff] }
  0xef   :  { %2775 = vmatpush3.bf16.msra.mxu1 %v2774_v3  ;;  %v2762_v3 = vpack.c.bf16 %v541_v61, %v540_v60  ;;  %v74_v7 = vmax.f32 %v42_v4, 0.0 }
  0xf0   :  { %2777 = vmatprep.subr.bf16.mxu1 %v2776_v8  ;;  %v76_v8 = vmax.f32 %v44_v6, 0.0 }
  0xf1   :  { %2747 = vmatpush3.bf16.msra.mxu0 %v2746_v14 }
  0xf2   :  { %2749 = vmatprep.subr.bf16.mxu0 %v2748_v16 }
  0xf3   :  { %2779 = vmatpush3.bf16.msra.mxu1 %v2778_v15 }
  0xf4   :  { %2781 = vmatprep.subr.bf16.mxu1 %v2780_v20 }
  0xf5   :  { %2751 = vmatpush3.bf16.msra.mxu0 %v2750_v26 }
  0xf6   :  { %2753 = vmatprep.subr.bf16.mxu0 %v2752_v28 }
  0xf7   :  { %2783 = vmatpush3.bf16.msra.mxu1 %v2782_v27  ;;  %v1756_v44 = vpop.f32.mrb[0].mxu0 }
  0xf8   :  { %2785 = vmatprep.subr.bf16.mxu1 %v2784_v32  ;;  %v1757_v50 = vpop.f32.mrb[1].mxu0 }
  0xf9   :  { %v1791_v51 = vpop.f32.mrb[0].mxu1  ;;  %v1758_v54 = vadd.f32 %v1757_v50, %v1756_v44  ;;  %2755 = vmatpush3.bf16.msra.mxu0 %v2754_v38 }
  0xfa   :  { %v1792_v55 = vpop.f32.mrb[1].mxu1  ;;  %2757 = vmatprep.subr.bf16.mxu0 %v2756_v40 }
  0xfb   :  { %v1793_v57 = vadd.f32 %v1792_v55, %v1791_v51  ;;  %2787 = vmatpush3.bf16.msra.mxu1 %v2786_v39  ;;  %v664_v62 = vadd.f32 %v1758_v54, %v1723_v49 }
  0xfc   :  { %2789 = vmatprep.subr.bf16.mxu1 %v2788_v45 }
  0xfd   :  { %v734_v2 = vadd.f32 %v1793_v57, %v664_v62  ;;  %2759 = vmatpush3.bf16.msra.mxu0 %v2758_v56 }
  0xfe   :  { %2761 = vmatprep.subr.bf16.mxu0 %v2760_v59 }
  0xff   :  { %2791 = vmatpush3.bf16.msra.mxu1 %v2790_v58 }
 0x100   :  { %2793 = vmatprep.subr.bf16.mxu1 %v2792_v63 }
 0x101   :  { %2763 = vmatpush3.bf16.msra.mxu0 %v2762_v3 }
 0x103   :  { %2795 = vmatpush3.bf16.msra.mxu1 %v2794_v5 }
 0x104   :  { %1642 = vmatmul.mubr.f32.vlgmr.msra.gmra.mrb[14].mxu0 %v74_v7 }
 0x106   :  { %1712 = vmatmul.mubr.f32.vlgmr.msra.gmra.mrb[14].mxu1 %v76_v8 }
 0x117   :  { %v1826_v9 = vpop.f32.mrb[2].mxu0 }
 0x118   :  { %v1827_v10 = vpop.f32.mrb[3].mxu0 }
 0x119   :  { %v1861_v11 = vpop.f32.mrb[2].mxu1  ;;  %v1828_v12 = vadd.f32 %v1827_v10, %v1826_v9 }
 0x11a   :  { %v1862_v13 = vpop.f32.mrb[3].mxu1 }
 0x11b   :  { %v1863_v14 = vadd.f32 %v1862_v13, %v1861_v11  ;;  %v804_v15 = vadd.f32 %v1828_v12, %v734_v2 }
 0x11d   :  { %v874_v16 = vadd.f32 %v1863_v14, %v804_v15 }
 0x137   :  { %v1896_v17 = vpop.f32.mrb[4].mxu0 }
 0x138   :  { %v1897_v18 = vpop.f32.mrb[5].mxu0 }
 0x139   :  { %v1931_v19 = vpop.f32.mrb[4].mxu1  ;;  %v1898_v20 = vadd.f32 %v1897_v18, %v1896_v17 }
 0x13a   :  { %v1932_v21 = vpop.f32.mrb[5].mxu1 }
 0x13b   :  { %v1933_v22 = vadd.f32 %v1932_v21, %v1931_v19  ;;  %v944_v23 = vadd.f32 %v1898_v20, %v874_v16 }
 0x13d   :  { %v1014_v24 = vadd.f32 %v1933_v22, %v944_v23 }
 0x157   :  { %v1966_v25 = vpop.f32.mrb[6].mxu0 }
 0x158   :  { %v1967_v26 = vpop.f32.mrb[7].mxu0 }
 0x159   :  { %v2001_v27 = vpop.f32.mrb[6].mxu1  ;;  %v1968_v28 = vadd.f32 %v1967_v26, %v1966_v25 }
 0x15a   :  { %v2002_v29 = vpop.f32.mrb[7].mxu1 }
 0x15b   :  { %v2003_v30 = vadd.f32 %v2002_v29, %v2001_v27  ;;  %v1084_v31 = vadd.f32 %v1968_v28, %v1014_v24 }
 0x15d   :  { %v1154_v32 = vadd.f32 %v2003_v30, %v1084_v31 }
 0x177   :  { %v2036_v33 = vpop.f32.mrb[8].mxu0 }
 0x178   :  { %v2037_v34 = vpop.f32.mrb[9].mxu0 }
 0x179   :  { %v2071_v35 = vpop.f32.mrb[8].mxu1  ;;  %v2038_v36 = vadd.f32 %v2037_v34, %v2036_v33 }
 0x17a   :  { %v2072_v37 = vpop.f32.mrb[9].mxu1 }
 0x17b   :  { %v2073_v38 = vadd.f32 %v2072_v37, %v2071_v35  ;;  %v1224_v39 = vadd.f32 %v2038_v36, %v1154_v32 }
 0x17d   :  { %v1294_v40 = vadd.f32 %v2073_v38, %v1224_v39 }
 0x197   :  { %v2106_v41 = vpop.f32.mrb[10].mxu0 }
 0x198   :  { %v2107_v42 = vpop.f32.mrb[11].mxu0 }
 0x199   :  { %v2141_v43 = vpop.f32.mrb[10].mxu1  ;;  %v2108_v44 = vadd.f32 %v2107_v42, %v2106_v41 }
 0x19a   :  { %v2142_v45 = vpop.f32.mrb[11].mxu1 }
 0x19b   :  { %v2143_v46 = vadd.f32 %v2142_v45, %v2141_v43  ;;  %v1364_v47 = vadd.f32 %v2108_v44, %v1294_v40 }
 0x19d   :  { %v1434_v48 = vadd.f32 %v2143_v46, %v1364_v47 }
 0x1b7   :  { %v2176_v49 = vpop.f32.mrb[12].mxu0 }
 0x1b8   :  { %v2177_v50 = vpop.f32.mrb[13].mxu0 }
 0x1b9   :  { %v2211_v51 = vpop.f32.mrb[12].mxu1  ;;  %v2178_v52 = vadd.f32 %v2177_v50, %v2176_v49 }
 0x1ba   :  { %v2212_v53 = vpop.f32.mrb[13].mxu1 }
 0x1bb   :  { %v2213_v54 = vadd.f32 %v2212_v53, %v2211_v51  ;;  %v1504_v55 = vadd.f32 %v2178_v52, %v1434_v48 }
 0x1bd   :  { %v1574_v56 = vadd.f32 %v2213_v54, %v1504_v55 }
 0x1d7   :  { %v2246_v57 = vpop.f32.mrb[14].mxu0 }
 0x1d8   :  { %v2247_v58 = vpop.f32.mrb[15].mxu0 }
 0x1d9   :  { %v2281_v59 = vpop.f32.mrb[14].mxu1  ;;  %v2248_v60 = vadd.f32 %v2247_v58, %v2246_v57 }
 0x1da   :  { %v2282_v61 = vpop.f32.mrb[15].mxu1 }
 0x1db   :  { %v2283_v62 = vadd.f32 %v2282_v61, %v2281_v59  ;;  %v1644_v63 = vadd.f32 %v2248_v60, %v1574_v56 }
 0x1dd   :  { %v1714_v0 = vadd.f32 %v2283_v62, %v1644_v63 }
 0x1df   :  { %1718 = vst.msk [vmem:[%s4457_s3] sm:$0xff] %vm1717_vm0, %v1714_v0 }

</bundles_post_ra>
